<compile_context>
chip_gen: v7x
topology: tpu7x:2x2x1
jax: 0.10.0
libtpu: 0.0.40
codegen_flags: <defaults>
</compile_context>

<pallas_src>
import jax
import jax.numpy as jnp
from jax import lax
from jax.experimental import pallas as pl
from jax.experimental.pallas import tpu as pltpu


_TN_TARGET = 1024                 # vocab tile (multiple of 128); fits v7x 64 MiB VMEM
_VMEM_LIMIT = 32 * 1024 * 1024    # explicit scoped-VMEM limit (raises v5e's 16 MiB default)


# ----------------------------------------------------------------------------
# Helpers
# ----------------------------------------------------------------------------
def _largest_divisor(n, cap):
    # TODO(synk): for prime/odd S this degenerates to 1-step tiles; pad S (with
    # output masking) or use pl.BoundedSlice for ragged sequence lengths.
    for d in range(min(n, cap), 0, -1):
        if n % d == 0:
            return d
    return 1


def _reorder_gates(w):
    """Permute the trailing 4H axis from torch's (i, f, g, o) to (i, f, o, g)."""
    i, f, g, o = jnp.split(w, 4, axis=-1)
    return jnp.concatenate([i, f, o, g], axis=-1)


def prepare_params(params):
    """One-time parameter prep (outside the jitted forward).

    - reorders gate columns,
    - folds Embedding + input projection into emb_proj = emb @ W_ih + b,
    - pads the vocab axis of the output layer to a lane-dense multiple of the
      vocab tile and casts the output weight to bf16.
    """
    w_ih_r = _reorder_gates(params["w_ih"])                    # (E, 4H)
    w_hh_r = _reorder_gates(params["w_hh"])                    # (H, 4H)
    b_r = _reorder_gates(params["b"])                          # (1, 4H)
    # Row-gather of (emb @ W_ih + b) is the same math as gather-then-project.
    emb_proj = params["emb"].astype(jnp.float32) @ w_ih_r + b_r  # (V, 4H)

    V = params["w_out"].shape[1]
    vp128 = pl.cdiv(V, 128) * 128
    tn = min(_TN_TARGET, vp128)
    Vp = pl.cdiv(vp128, tn) * tn
    w_out_p = jnp.pad(params["w_out"], ((0, 0), (0, Vp - V))).astype(jnp.bfloat16)
    b_out_p = jnp.pad(params["b_out"], ((0, 0), (0, Vp - V)))

    return {
        "emb_proj": emb_proj,          # (V, 4H)  f32
        "w_hh": w_hh_r,                # (H, 4H)  f32 (latency-bound recurrence)
        "w_out": w_out_p,              # (H, Vp)  bf16
        "b_out": b_out_p,              # (1, Vp)  f32
    }


# ----------------------------------------------------------------------------
# Output projection: (S, B, H) bf16 @ (H, Vp) bf16 + (1, Vp) -> (S, B, Vp) f32
# Vocab-tiled; vocab axis is the OUTER grid axis so the weight tile is reused
# across every S step before moving to the next vocab tile.
# ----------------------------------------------------------------------------
def _out_proj_kernel(x_ref, w_ref, b_ref, o_ref):
    t, b, h = x_ref.shape
    n = w_ref.shape[1]
    # Merging (t, B) is a layout no-op only when B is a multiple of 8 (f32
    # sublane) / 16 (bf16); the module default B used here satisfies it.
    x2 = x_ref[...].reshape(t * b, h)                              # bf16
    y = jnp.dot(x2, w_ref[...], preferred_element_type=jnp.float32) + b_ref[...]
    o_ref[...] = y.reshape(t, b, n).astype(o_ref.dtype)


def _output_projection(x_bf16, w_bf16, b_f32, *, tn):
    S, B, H = x_bf16.shape
    Vp = w_bf16.shape[1]
    sb = _largest_divisor(S, 32)
    # TODO(synk): pipeline_mode=pl.Buffered(1) on the weight/bias specs would
    # halve their resident VMEM (big win at large V on v7x).
    return pl.pallas_call(
        _out_proj_kernel,
        out_shape=jax.ShapeDtypeStruct((S, B, Vp), jnp.float32),
        grid_spec=pltpu.PrefetchScalarGridSpec(
            num_scalar_prefetch=0,
            grid=(Vp // tn, S // sb),          # vocab OUTER, seq INNER
            in_specs=[
                pl.BlockSpec((sb, B, H), lambda n, s: (s, 0, 0)),
                pl.BlockSpec((H, tn), lambda n, s: (0, n)),
                pl.BlockSpec((1, tn), lambda n, s: (0, n)),
            ],
            out_specs=pl.BlockSpec((sb, B, tn), lambda n, s: (s, 0, n)),
        ),
        compiler_params=pltpu.CompilerParams(
            dimension_semantics=("parallel", "parallel"),
            vmem_limit_bytes=_VMEM_LIMIT),
    )(x_bf16, w_bf16, b_f32)


# ----------------------------------------------------------------------------
# LSTM recurrence kernel: one grid step == T timesteps (sequential carry).
# h/c are carried in vregs via the fori_loop carry; the VMEM scratch (and
# hn/cn) is touched once per chunk.  Per timestep: one h@W_hh MXU pass + one
# contiguous sigmoid pass + one tanh pass (x-projection & bias pre-folded).
# ----------------------------------------------------------------------------
def _lstm_recurrence_kernel(xproj_ref, whh_ref, out_ref, hn_ref, cn_ref,
                            h_scr, c_scr):
    ci = pl.program_id(0)
    T = xproj_ref.shape[0]
    H = whh_ref.shape[0]

    @pl.when(ci == 0)
    def _():
        # hidden=None in the PyTorch forward -> zero initial state.
        h_scr[...] = jnp.zeros_like(h_scr)
        c_scr[...] = jnp.zeros_like(c_scr)

    # TODO(synk): hold W_hh resident in the MXU across the chunk with
    # pltpu.matmul_push_rhs / matmul_acc_lhs to take the weight push off the
    # serial critical path (LHS is only B rows).
    w_hh = whh_ref[...]                                            # (H, 4H) f32

    def step(t, carry):
        h_prev, c_prev = carry
        gates = xproj_ref[t] + jnp.dot(
            h_prev, w_hh, preferred_element_type=jnp.float32)      # (B, 4H)
        # gate order is (i, f, o, g): one contiguous sigmoid pass.
        sig = jax.nn.sigmoid(gates[:, 0:3 * H])
        i = sig[:, 0 * H:1 * H]
        f = sig[:, 1 * H:2 * H]
        o = sig[:, 2 * H:3 * H]
        g = jnp.tanh(gates[:, 3 * H:4 * H])
        c = f * c_prev + i * g
        h = o * jnp.tanh(c)
        out_ref[t] = h.astype(out_ref.dtype)                       # bf16 store
        return (h, c)

    h_fin, c_fin = lax.fori_loop(
        0, T, step, (h_scr[...], c_scr[...]), unroll=min(8, T))

    h_scr[...] = h_fin
    c_scr[...] = c_fin

    @pl.when(ci == pl.num_programs(0) - 1)
    def _():
        hn_ref[...] = h_fin
        cn_ref[...] = c_fin


# ----------------------------------------------------------------------------
# Wrapper: gather from emb_proj -> recurrence -> vocab-tiled output projection.
# ----------------------------------------------------------------------------
def rnnlm_pallas(inputs, prep, *, vocab_size):
    """inputs: (S, B) int32. Returns (logits (S,B,V), (h_n, c_n) each (1,B,H))."""
    S, B = inputs.shape
    H = prep["w_hh"].shape[0]
    Vp = prep["w_out"].shape[1]

    # Embedding gather fused with the (already hoisted) input projection:
    # row gather from the precomputed (V, 4H) table -> (S, B, 4H) gates input.
    xproj = jnp.take(prep["emb_proj"], inputs, axis=0)

    # Sequential LSTM recurrence, up to 128 timesteps per grid iteration.
    t_chunk = _largest_divisor(S, 128)
    lstm_out, h_n, c_n = pl.pallas_call(
        _lstm_recurrence_kernel,
        out_shape=(
            jax.ShapeDtypeStruct((S, B, H), jnp.bfloat16),
            jax.ShapeDtypeStruct((B, H), jnp.float32),
            jax.ShapeDtypeStruct((B, H), jnp.float32),
        ),
        grid_spec=pltpu.PrefetchScalarGridSpec(
            num_scalar_prefetch=0,
            grid=(S // t_chunk,),
            in_specs=[
                pl.BlockSpec((t_chunk, B, 4 * H), lambda s: (s, 0, 0)),
                pl.BlockSpec((H, 4 * H), lambda s: (0, 0)),
            ],
            out_specs=[
                pl.BlockSpec((t_chunk, B, H), lambda s: (s, 0, 0)),
                pl.BlockSpec((B, H), lambda s: (0, 0)),   # constant map: resident
                pl.BlockSpec((B, H), lambda s: (0, 0)),
            ],
            scratch_shapes=[
                pltpu.VMEM((B, H), jnp.float32),          # h carry across chunks
                pltpu.VMEM((B, H), jnp.float32),          # c carry across chunks
            ],
        ),
        compiler_params=pltpu.CompilerParams(
            dimension_semantics=("arbitrary",),           # true recurrence
            vmem_limit_bytes=_VMEM_LIMIT),
    )(xproj, prep["w_hh"])

    # Output projection (bf16 operands, f32 accumulation), vocab-tiled.
    tn = min(_TN_TARGET, Vp)
    logits_p = _output_projection(lstm_out, prep["w_out"], prep["b_out"], tn=tn)

    # TODO(synk): for large V, mask the final vocab tile in-kernel (or alias a
    # pre-padded output) instead of this wrapper slice, which re-reads and
    # re-writes the padded logits in HBM.
    logits = logits_p[:, :, :vocab_size]

    # PyTorch returns hidden as (num_layers*num_directions, B, H) == (1, B, H).
    return logits, (h_n[None, :, :], c_n[None, :, :])


# ----------------------------------------------------------------------------
# Pure-JAX reference (torch gate order, f32) for the correctness check.
# ----------------------------------------------------------------------------
def rnnlm_ref(inputs, params):
    emb = jnp.take(params["emb"], inputs, axis=0)
    H = params["w_hh"].shape[0]
    B = inputs.shape[1]

    def step(carry, x_t):
        h, c = carry
        gates = x_t @ params["w_ih"] + h @ params["w_hh"] + params["b"]
        i = jax.nn.sigmoid(gates[:, 0 * H:1 * H])
        f = jax.nn.sigmoid(gates[:, 1 * H:2 * H])
        g = jnp.tanh(gates[:, 2 * H:3 * H])
        o = jax.nn.sigmoid(gates[:, 3 * H:4 * H])
        c = f * c + i * g
        h = o * jnp.tanh(c)
        return (h, c), h

    h0 = jnp.zeros((B, H), jnp.float32)
    c0 = jnp.zeros((B, H), jnp.float32)
    (h_n, c_n), lstm_out = lax.scan(step, (h0, c0), emb)
    logits = lstm_out @ params["w_out"] + params["b_out"]
    return logits, (h_n[None], c_n[None])


def init_params(key, vocab_size, emb_dim, hidden_dim):
    ks = jax.random.split(key, 7)
    k = 1.0 / jnp.sqrt(hidden_dim)
    u = lambda kk, shape, s: jax.random.uniform(kk, shape, jnp.float32, -s, s)
    # Torch shapes: emb (V,E); w_ih (4H,E); w_hh (4H,H); linear W (V,H).
    # Stored pre-transposed for x @ W; gate order along 4H is torch's (i,f,g,o).
    return {
        "emb":   jax.random.normal(ks[0], (vocab_size, emb_dim), jnp.float32),
        "w_ih":  u(ks[1], (emb_dim, 4 * hidden_dim), k),
        "w_hh":  u(ks[2], (hidden_dim, 4 * hidden_dim), k),
        "b":     (u(ks[3], (1, 4 * hidden_dim), k)
                  + u(ks[4], (1, 4 * hidden_dim), k)),      # b_ih + b_hh
        "w_out": u(ks[5], (hidden_dim, vocab_size), k),
        "b_out": u(ks[6], (1, vocab_size), k),
    }


if __name__ == "__main__":
    VOCAB, EMB, HID = 50, 16, 128     # module defaults: emb_dim=16, hidden=128
    SEQ, BATCH = 8, 8

    key = jax.random.PRNGKey(0)
    pkey, ikey = jax.random.split(key)
    params = init_params(pkey, VOCAB, EMB, HID)
    inputs = jax.random.randint(ikey, (SEQ, BATCH), 0, VOCAB, dtype=jnp.int32)

    prep = prepare_params(params)     # one-time prep, outside the jitted forward
    fwd = jax.jit(rnnlm_pallas, static_argnames=("vocab_size",))

    logits, (h_n, c_n) = jax.block_until_ready(
        fwd(inputs, prep, vocab_size=VOCAB))

    ref_logits, (ref_h, ref_c) = rnnlm_ref(inputs, params)
    assert logits.shape == (SEQ, BATCH, VOCAB)
    assert h_n.shape == (1, BATCH, HID) and c_n.shape == (1, BATCH, HID)
    # Recurrence / hidden state runs in f32 -> tight tolerance.
    assert jnp.allclose(h_n, ref_h, atol=5e-4, rtol=5e-4)
    assert jnp.allclose(c_n, ref_c, atol=5e-4, rtol=5e-4)
    # Output projection uses bf16 operands (f32 accumulation) -> looser tolerance.
    assert jnp.allclose(logits, ref_logits, atol=3e-2, rtol=3e-2)

    print("KERNEL_OK")
</pallas_src>

<mosaic_0001>
module attributes {stable_mosaic.version = 11 : i64} {
  func.func @_out_proj_kernel(%arg0: i32, %arg1: i32, %arg2: memref<8x8x128xbf16, #tpu.memory_space<vmem>>, %arg3: memref<128x128xbf16, #tpu.memory_space<vmem>>, %arg4: memref<1x128xf32, #tpu.memory_space<vmem>>, %arg5: memref<8x8x128xf32, #tpu.memory_space<vmem>>) attributes {dimension_semantics = [#tpu.dimension_semantics<parallel>, #tpu.dimension_semantics<parallel>], iteration_bounds = array<i64: 1, 1>, scalar_prefetch = 0 : i64, scratch_operands = 0 : i64, tpu.core_type = #tpu.core_type<tc>, window_params = [{transform_indices = @transform_0, window_bounds = array<i64: 8, 8, 128>}, {transform_indices = @transform_1, window_bounds = array<i64: 128, 128>}, {transform_indices = @transform_2, window_bounds = array<i64: 1, 128>}, {transform_indices = @transform_3, window_bounds = array<i64: 8, 8, 128>}]} {
    %c0 = arith.constant 0 : index
    %c0_0 = arith.constant 0 : index
    %c0_1 = arith.constant 0 : index
    %0 = vector.load %arg2[%c0, %c0_0, %c0_1] : memref<8x8x128xbf16, #tpu.memory_space<vmem>>, vector<8x8x128xbf16>
    %1 = vector.shape_cast %0 : vector<8x8x128xbf16> to vector<64x128xbf16>
    %c0_2 = arith.constant 0 : index
    %c0_3 = arith.constant 0 : index
    %2 = vector.load %arg3[%c0_2, %c0_3] : memref<128x128xbf16, #tpu.memory_space<vmem>>, vector<128x128xbf16>
    %cst = arith.constant dense<0.000000e+00> : vector<64x128xf32>
    %3 = tpu.matmul %1, %2, %cst {dimension_numbers = #tpu.dot_dimension_numbers<[1], [0], [0], [1], [0, 0, 1, 1], [], []>} : vector<64x128xbf16>, vector<128x128xbf16>, vector<64x128xf32> -> vector<64x128xf32>
    %c0_4 = arith.constant 0 : index
    %c0_5 = arith.constant 0 : index
    %4 = vector.load %arg4[%c0_4, %c0_5] : memref<1x128xf32, #tpu.memory_space<vmem>>, vector<1x128xf32>
    %5 = vector.broadcast %4 : vector<1x128xf32> to vector<64x128xf32>
    %6 = arith.addf %3, %5 : vector<64x128xf32>
    %7 = vector.shape_cast %6 : vector<64x128xf32> to vector<8x8x128xf32>
    %c0_6 = arith.constant 0 : index
    %c0_7 = arith.constant 0 : index
    %c0_8 = arith.constant 0 : index
    %8 = vector.load %arg5[%c0_6, %c0_7, %c0_8] : memref<8x8x128xf32, #tpu.memory_space<vmem>>, vector<8x8x128xf32>
    tpu.vector_store %arg5[%c0_6, %c0_7, %c0_8], %7 {strides = array<i32>} : memref<8x8x128xf32, #tpu.memory_space<vmem>>, vector<8x8x128xf32>,
    return
  }
  func.func @transform_0(%arg0: i32, %arg1: i32) -> (i32, i32, i32) {
    %c0_i32 = arith.constant 0 : i32
    %c0_i32_0 = arith.constant 0 : i32
    %c0_i32_1 = arith.constant 0 : i32
    return %arg1, %c0_i32, %c0_i32_0 : i32, i32, i32
  }
  func.func @transform_1(%arg0: i32, %arg1: i32) -> (i32, i32) {
    %c0_i32 = arith.constant 0 : i32
    %c0_i32_0 = arith.constant 0 : i32
    return %c0_i32, %arg0 : i32, i32
  }
  func.func @transform_2(%arg0: i32, %arg1: i32) -> (i32, i32) {
    %c0_i32 = arith.constant 0 : i32
    %c0_i32_0 = arith.constant 0 : i32
    return %c0_i32, %arg0 : i32, i32
  }
  func.func @transform_3(%arg0: i32, %arg1: i32) -> (i32, i32, i32) {
    %c0_i32 = arith.constant 0 : i32
    %c0_i32_0 = arith.constant 0 : i32
    return %arg1, %c0_i32, %arg0 : i32, i32, i32
  }
}

module attributes {stable_mosaic.version = 11 : i64} {
  func.func @_lstm_recurrence_kernel(%arg0: i32, %arg1: memref<8x8x512xf32, #tpu.memory_space<vmem>>, %arg2: memref<128x512xf32, #tpu.memory_space<vmem>>, %arg3: memref<8x8x128xbf16, #tpu.memory_space<vmem>>, %arg4: memref<8x128xf32, #tpu.memory_space<vmem>>, %arg5: memref<8x128xf32, #tpu.memory_space<vmem>>, %arg6: memref<8x128xf32, #tpu.memory_space<vmem>>, %arg7: memref<8x128xf32, #tpu.memory_space<vmem>>) attributes {dimension_semantics = [#tpu.dimension_semantics<arbitrary>], iteration_bounds = array<i64: 1>, scalar_prefetch = 0 : i64, scratch_operands = 2 : i64, tpu.core_type = #tpu.core_type<tc>, window_params = [{transform_indices = @transform_0, window_bounds = array<i64: 8, 8, 512>}, {pipeline_mode = #tpu.pipeline_mode<synchronous>, transform_indices = @transform_1, window_bounds = array<i64: 128, 512>}, {transform_indices = @transform_2, window_bounds = array<i64: 8, 8, 128>}, {pipeline_mode = #tpu.pipeline_mode<synchronous>, transform_indices = @transform_3, window_bounds = array<i64: 8, 128>}, {pipeline_mode = #tpu.pipeline_mode<synchronous>, transform_indices = @transform_4, window_bounds = array<i64: 8, 128>}]} {
    %c0_i32 = arith.constant 0 : i32
    %0 = arith.cmpi eq, %arg0, %c0_i32 : i32
    %1 = arith.extui %0 : i1 to i32
    %c0_i32_0 = arith.constant 0 : i32
    %2 = arith.cmpi ne, %1, %c0_i32_0 : i32
    scf.if %2 {
      %cst_60 = arith.constant 0.000000e+00 : f32
      %219 = vector.broadcast %cst_60 : f32 to vector<8x128xf32>
      %c0_61 = arith.constant 0 : index
      %c0_62 = arith.constant 0 : index
      %220 = vector.load %arg6[%c0_61, %c0_62] : memref<8x128xf32, #tpu.memory_space<vmem>>, vector<8x128xf32>
      tpu.vector_store %arg6[%c0_61, %c0_62], %219 {strides = array<i32>} : memref<8x128xf32, #tpu.memory_space<vmem>>, vector<8x128xf32>,
      %cst_63 = arith.constant 0.000000e+00 : f32
      %221 = vector.broadcast %cst_63 : f32 to vector<8x128xf32>
      %c0_64 = arith.constant 0 : index
      %c0_65 = arith.constant 0 : index
      %222 = vector.load %arg7[%c0_64, %c0_65] : memref<8x128xf32, #tpu.memory_space<vmem>>, vector<8x128xf32>
      tpu.vector_store %arg7[%c0_64, %c0_65], %221 {strides = array<i32>} : memref<8x128xf32, #tpu.memory_space<vmem>>, vector<8x128xf32>,
    } else {
    }
    %c0 = arith.constant 0 : index
    %c0_1 = arith.constant 0 : index
    %3 = vector.load %arg2[%c0, %c0_1] : memref<128x512xf32, #tpu.memory_space<vmem>>, vector<128x512xf32>
    %c0_2 = arith.constant 0 : index
    %c0_3 = arith.constant 0 : index
    %4 = vector.load %arg6[%c0_2, %c0_3] : memref<8x128xf32, #tpu.memory_space<vmem>>, vector<8x128xf32>
    %c0_4 = arith.constant 0 : index
    %c0_5 = arith.constant 0 : index
    %5 = vector.load %arg7[%c0_4, %c0_5] : memref<8x128xf32, #tpu.memory_space<vmem>>, vector<8x128xf32>
    %c0_i32_6 = arith.constant 0 : i32
    %6 = arith.index_cast %c0_i32_6 : i32 to index
    %c0_7 = arith.constant 0 : index
    %c0_8 = arith.constant 0 : index
    %7 = vector.load %arg1[%6, %c0_7, %c0_8] : memref<8x8x512xf32, #tpu.memory_space<vmem>>, vector<1x8x512xf32>
    %8 = vector.shape_cast %7 : vector<1x8x512xf32> to vector<8x512xf32>
    %cst = arith.constant dense<0.000000e+00> : vector<8x512xf32>
    %9 = tpu.matmul %4, %3, %cst {dimension_numbers = #tpu.dot_dimension_numbers<[1], [0], [0], [1], [0, 0, 1, 1], [], []>} : vector<8x128xf32>, vector<128x512xf32>, vector<8x512xf32> -> vector<8x512xf32>
    %10 = arith.addf %8, %9 : vector<8x512xf32>
    %11 = vector.extract_strided_slice %10 {offsets = [0, 0], sizes = [8, 384], strides = [1, 1]} : vector<8x512xf32> to vector<8x384xf32>
    %12 = arith.negf %11 : vector<8x384xf32>
    %13 = math.exp %12 : vector<8x384xf32>
    %cst_9 = arith.constant 1.000000e+00 : f32
    %14 = vector.broadcast %cst_9 : f32 to vector<8x384xf32>
    %15 = arith.addf %14, %13 : vector<8x384xf32>
    %16 = arith.divf %14, %15 : vector<8x384xf32>
    %17 = vector.extract_strided_slice %16 {offsets = [0, 0], sizes = [8, 128], strides = [1, 1]} : vector<8x384xf32> to vector<8x128xf32>
    %18 = vector.extract_strided_slice %16 {offsets = [0, 128], sizes = [8, 128], strides = [1, 1]} : vector<8x384xf32> to vector<8x128xf32>
    %19 = vector.extract_strided_slice %16 {offsets = [0, 256], sizes = [8, 128], strides = [1, 1]} : vector<8x384xf32> to vector<8x128xf32>
    %20 = vector.extract_strided_slice %10 {offsets = [0, 384], sizes = [8, 128], strides = [1, 1]} : vector<8x512xf32> to vector<8x128xf32>
    %21 = math.tanh %20 : vector<8x128xf32>
    %22 = arith.mulf %18, %5 : vector<8x128xf32>
    %23 = arith.mulf %17, %21 : vector<8x128xf32>
    %24 = arith.addf %22, %23 : vector<8x128xf32>
    %25 = math.tanh %24 : vector<8x128xf32>
    %26 = arith.mulf %19, %25 : vector<8x128xf32>
    %27 = arith.truncf %26 : vector<8x128xf32> to vector<8x128xbf16>
    %28 = arith.index_cast %c0_i32_6 : i32 to index
    %c0_10 = arith.constant 0 : index
    %c0_11 = arith.constant 0 : index
    %29 = vector.load %arg3[%28, %c0_10, %c0_11] : memref<8x8x128xbf16, #tpu.memory_space<vmem>>, vector<1x8x128xbf16>
    %30 = vector.shape_cast %29 : vector<1x8x128xbf16> to vector<8x128xbf16>
    %31 = vector.shape_cast %27 : vector<8x128xbf16> to vector<1x8x128xbf16>
    tpu.vector_store %arg3[%28, %c0_10, %c0_11], %31 {strides = array<i32>} : memref<8x8x128xbf16, #tpu.memory_space<vmem>>, vector<1x8x128xbf16>,
    %c1_i32 = arith.constant 1 : i32
    %32 = arith.index_cast %c1_i32 : i32 to index
    %c0_12 = arith.constant 0 : index
    %c0_13 = arith.constant 0 : index
    %33 = vector.load %arg1[%32, %c0_12, %c0_13] : memref<8x8x512xf32, #tpu.memory_space<vmem>>, vector<1x8x512xf32>
    %34 = vector.shape_cast %33 : vector<1x8x512xf32> to vector<8x512xf32>
    %cst_14 = arith.constant dense<0.000000e+00> : vector<8x512xf32>
    %35 = tpu.matmul %26, %3, %cst_14 {dimension_numbers = #tpu.dot_dimension_numbers<[1], [0], [0], [1], [0, 0, 1, 1], [], []>} : vector<8x128xf32>, vector<128x512xf32>, vector<8x512xf32> -> vector<8x512xf32>
    %36 = arith.addf %34, %35 : vector<8x512xf32>
    %37 = vector.extract_strided_slice %36 {offsets = [0, 0], sizes = [8, 384], strides = [1, 1]} : vector<8x512xf32> to vector<8x384xf32>
    %38 = arith.negf %37 : vector<8x384xf32>
    %39 = math.exp %38 : vector<8x384xf32>
    %cst_15 = arith.constant 1.000000e+00 : f32
    %40 = vector.broadcast %cst_15 : f32 to vector<8x384xf32>
    %41 = arith.addf %40, %39 : vector<8x384xf32>
    %42 = arith.divf %40, %41 : vector<8x384xf32>
    %43 = vector.extract_strided_slice %42 {offsets = [0, 0], sizes = [8, 128], strides = [1, 1]} : vector<8x384xf32> to vector<8x128xf32>
    %44 = vector.extract_strided_slice %42 {offsets = [0, 128], sizes = [8, 128], strides = [1, 1]} : vector<8x384xf32> to vector<8x128xf32>
    %45 = vector.extract_strided_slice %42 {offsets = [0, 256], sizes = [8, 128], strides = [1, 1]} : vector<8x384xf32> to vector<8x128xf32>
    %46 = vector.extract_strided_slice %36 {offsets = [0, 384], sizes = [8, 128], strides = [1, 1]} : vector<8x512xf32> to vector<8x128xf32>
    %47 = math.tanh %46 : vector<8x128xf32>
    %48 = arith.mulf %44, %24 : vector<8x128xf32>
    %49 = arith.mulf %43, %47 : vector<8x128xf32>
    %50 = arith.addf %48, %49 : vector<8x128xf32>
    %51 = math.tanh %50 : vector<8x128xf32>
    %52 = arith.mulf %45, %51 : vector<8x128xf32>
    %53 = arith.truncf %52 : vector<8x128xf32> to vector<8x128xbf16>
    %54 = arith.index_cast %c1_i32 : i32 to index
    %c0_16 = arith.constant 0 : index
    %c0_17 = arith.constant 0 : index
    %55 = vector.load %arg3[%54, %c0_16, %c0_17] : memref<8x8x128xbf16, #tpu.memory_space<vmem>>, vector<1x8x128xbf16>
    %56 = vector.shape_cast %55 : vector<1x8x128xbf16> to vector<8x128xbf16>
    %57 = vector.shape_cast %53 : vector<8x128xbf16> to vector<1x8x128xbf16>
    tpu.vector_store %arg3[%54, %c0_16, %c0_17], %57 {strides = array<i32>} : memref<8x8x128xbf16, #tpu.memory_space<vmem>>, vector<1x8x128xbf16>,
    %c2_i32 = arith.constant 2 : i32
    %58 = arith.index_cast %c2_i32 : i32 to index
    %c0_18 = arith.constant 0 : index
    %c0_19 = arith.constant 0 : index
    %59 = vector.load %arg1[%58, %c0_18, %c0_19] : memref<8x8x512xf32, #tpu.memory_space<vmem>>, vector<1x8x512xf32>
    %60 = vector.shape_cast %59 : vector<1x8x512xf32> to vector<8x512xf32>
    %cst_20 = arith.constant dense<0.000000e+00> : vector<8x512xf32>
    %61 = tpu.matmul %52, %3, %cst_20 {dimension_numbers = #tpu.dot_dimension_numbers<[1], [0], [0], [1], [0, 0, 1, 1], [], []>} : vector<8x128xf32>, vector<128x512xf32>, vector<8x512xf32> -> vector<8x512xf32>
    %62 = arith.addf %60, %61 : vector<8x512xf32>
    %63 = vector.extract_strided_slice %62 {offsets = [0, 0], sizes = [8, 384], strides = [1, 1]} : vector<8x512xf32> to vector<8x384xf32>
    %64 = arith.negf %63 : vector<8x384xf32>
    %65 = math.exp %64 : vector<8x384xf32>
    %cst_21 = arith.constant 1.000000e+00 : f32
    %66 = vector.broadcast %cst_21 : f32 to vector<8x384xf32>
    %67 = arith.addf %66, %65 : vector<8x384xf32>
    %68 = arith.divf %66, %67 : vector<8x384xf32>
    %69 = vector.extract_strided_slice %68 {offsets = [0, 0], sizes = [8, 128], strides = [1, 1]} : vector<8x384xf32> to vector<8x128xf32>
    %70 = vector.extract_strided_slice %68 {offsets = [0, 128], sizes = [8, 128], strides = [1, 1]} : vector<8x384xf32> to vector<8x128xf32>
    %71 = vector.extract_strided_slice %68 {offsets = [0, 256], sizes = [8, 128], strides = [1, 1]} : vector<8x384xf32> to vector<8x128xf32>
    %72 = vector.extract_strided_slice %62 {offsets = [0, 384], sizes = [8, 128], strides = [1, 1]} : vector<8x512xf32> to vector<8x128xf32>
    %73 = math.tanh %72 : vector<8x128xf32>
    %74 = arith.mulf %70, %50 : vector<8x128xf32>
    %75 = arith.mulf %69, %73 : vector<8x128xf32>
    %76 = arith.addf %74, %75 : vector<8x128xf32>
    %77 = math.tanh %76 : vector<8x128xf32>
    %78 = arith.mulf %71, %77 : vector<8x128xf32>
    %79 = arith.truncf %78 : vector<8x128xf32> to vector<8x128xbf16>
    %80 = arith.index_cast %c2_i32 : i32 to index
    %c0_22 = arith.constant 0 : index
    %c0_23 = arith.constant 0 : index
    %81 = vector.load %arg3[%80, %c0_22, %c0_23] : memref<8x8x128xbf16, #tpu.memory_space<vmem>>, vector<1x8x128xbf16>
    %82 = vector.shape_cast %81 : vector<1x8x128xbf16> to vector<8x128xbf16>
    %83 = vector.shape_cast %79 : vector<8x128xbf16> to vector<1x8x128xbf16>
    tpu.vector_store %arg3[%80, %c0_22, %c0_23], %83 {strides = array<i32>} : memref<8x8x128xbf16, #tpu.memory_space<vmem>>, vector<1x8x128xbf16>,
    %c3_i32 = arith.constant 3 : i32
    %84 = arith.index_cast %c3_i32 : i32 to index
    %c0_24 = arith.constant 0 : index
    %c0_25 = arith.constant 0 : index
    %85 = vector.load %arg1[%84, %c0_24, %c0_25] : memref<8x8x512xf32, #tpu.memory_space<vmem>>, vector<1x8x512xf32>
    %86 = vector.shape_cast %85 : vector<1x8x512xf32> to vector<8x512xf32>
    %cst_26 = arith.constant dense<0.000000e+00> : vector<8x512xf32>
    %87 = tpu.matmul %78, %3, %cst_26 {dimension_numbers = #tpu.dot_dimension_numbers<[1], [0], [0], [1], [0, 0, 1, 1], [], []>} : vector<8x128xf32>, vector<128x512xf32>, vector<8x512xf32> -> vector<8x512xf32>
    %88 = arith.addf %86, %87 : vector<8x512xf32>
    %89 = vector.extract_strided_slice %88 {offsets = [0, 0], sizes = [8, 384], strides = [1, 1]} : vector<8x512xf32> to vector<8x384xf32>
    %90 = arith.negf %89 : vector<8x384xf32>
    %91 = math.exp %90 : vector<8x384xf32>
    %cst_27 = arith.constant 1.000000e+00 : f32
    %92 = vector.broadcast %cst_27 : f32 to vector<8x384xf32>
    %93 = arith.addf %92, %91 : vector<8x384xf32>
    %94 = arith.divf %92, %93 : vector<8x384xf32>
    %95 = vector.extract_strided_slice %94 {offsets = [0, 0], sizes = [8, 128], strides = [1, 1]} : vector<8x384xf32> to vector<8x128xf32>
    %96 = vector.extract_strided_slice %94 {offsets = [0, 128], sizes = [8, 128], strides = [1, 1]} : vector<8x384xf32> to vector<8x128xf32>
    %97 = vector.extract_strided_slice %94 {offsets = [0, 256], sizes = [8, 128], strides = [1, 1]} : vector<8x384xf32> to vector<8x128xf32>
    %98 = vector.extract_strided_slice %88 {offsets = [0, 384], sizes = [8, 128], strides = [1, 1]} : vector<8x512xf32> to vector<8x128xf32>
    %99 = math.tanh %98 : vector<8x128xf32>
    %100 = arith.mulf %96, %76 : vector<8x128xf32>
    %101 = arith.mulf %95, %99 : vector<8x128xf32>
    %102 = arith.addf %100, %101 : vector<8x128xf32>
    %103 = math.tanh %102 : vector<8x128xf32>
    %104 = arith.mulf %97, %103 : vector<8x128xf32>
    %105 = arith.truncf %104 : vector<8x128xf32> to vector<8x128xbf16>
    %106 = arith.index_cast %c3_i32 : i32 to index
    %c0_28 = arith.constant 0 : index
    %c0_29 = arith.constant 0 : index
    %107 = vector.load %arg3[%106, %c0_28, %c0_29] : memref<8x8x128xbf16, #tpu.memory_space<vmem>>, vector<1x8x128xbf16>
    %108 = vector.shape_cast %107 : vector<1x8x128xbf16> to vector<8x128xbf16>
    %109 = vector.shape_cast %105 : vector<8x128xbf16> to vector<1x8x128xbf16>
    tpu.vector_store %arg3[%106, %c0_28, %c0_29], %109 {strides = array<i32>} : memref<8x8x128xbf16, #tpu.memory_space<vmem>>, vector<1x8x128xbf16>,
    %c4_i32 = arith.constant 4 : i32
    %110 = arith.index_cast %c4_i32 : i32 to index
    %c0_30 = arith.constant 0 : index
    %c0_31 = arith.constant 0 : index
    %111 = vector.load %arg1[%110, %c0_30, %c0_31] : memref<8x8x512xf32, #tpu.memory_space<vmem>>, vector<1x8x512xf32>
    %112 = vector.shape_cast %111 : vector<1x8x512xf32> to vector<8x512xf32>
    %cst_32 = arith.constant dense<0.000000e+00> : vector<8x512xf32>
    %113 = tpu.matmul %104, %3, %cst_32 {dimension_numbers = #tpu.dot_dimension_numbers<[1], [0], [0], [1], [0, 0, 1, 1], [], []>} : vector<8x128xf32>, vector<128x512xf32>, vector<8x512xf32> -> vector<8x512xf32>
    %114 = arith.addf %112, %113 : vector<8x512xf32>
    %115 = vector.extract_strided_slice %114 {offsets = [0, 0], sizes = [8, 384], strides = [1, 1]} : vector<8x512xf32> to vector<8x384xf32>
    %116 = arith.negf %115 : vector<8x384xf32>
    %117 = math.exp %116 : vector<8x384xf32>
    %cst_33 = arith.constant 1.000000e+00 : f32
    %118 = vector.broadcast %cst_33 : f32 to vector<8x384xf32>
    %119 = arith.addf %118, %117 : vector<8x384xf32>
    %120 = arith.divf %118, %119 : vector<8x384xf32>
    %121 = vector.extract_strided_slice %120 {offsets = [0, 0], sizes = [8, 128], strides = [1, 1]} : vector<8x384xf32> to vector<8x128xf32>
    %122 = vector.extract_strided_slice %120 {offsets = [0, 128], sizes = [8, 128], strides = [1, 1]} : vector<8x384xf32> to vector<8x128xf32>
    %123 = vector.extract_strided_slice %120 {offsets = [0, 256], sizes = [8, 128], strides = [1, 1]} : vector<8x384xf32> to vector<8x128xf32>
    %124 = vector.extract_strided_slice %114 {offsets = [0, 384], sizes = [8, 128], strides = [1, 1]} : vector<8x512xf32> to vector<8x128xf32>
    %125 = math.tanh %124 : vector<8x128xf32>
    %126 = arith.mulf %122, %102 : vector<8x128xf32>
    %127 = arith.mulf %121, %125 : vector<8x128xf32>
    %128 = arith.addf %126, %127 : vector<8x128xf32>
    %129 = math.tanh %128 : vector<8x128xf32>
    %130 = arith.mulf %123, %129 : vector<8x128xf32>
    %131 = arith.truncf %130 : vector<8x128xf32> to vector<8x128xbf16>
    %132 = arith.index_cast %c4_i32 : i32 to index
    %c0_34 = arith.constant 0 : index
    %c0_35 = arith.constant 0 : index
    %133 = vector.load %arg3[%132, %c0_34, %c0_35] : memref<8x8x128xbf16, #tpu.memory_space<vmem>>, vector<1x8x128xbf16>
    %134 = vector.shape_cast %133 : vector<1x8x128xbf16> to vector<8x128xbf16>
    %135 = vector.shape_cast %131 : vector<8x128xbf16> to vector<1x8x128xbf16>
    tpu.vector_store %arg3[%132, %c0_34, %c0_35], %135 {strides = array<i32>} : memref<8x8x128xbf16, #tpu.memory_space<vmem>>, vector<1x8x128xbf16>,
    %c5_i32 = arith.constant 5 : i32
    %136 = arith.index_cast %c5_i32 : i32 to index
    %c0_36 = arith.constant 0 : index
    %c0_37 = arith.constant 0 : index
    %137 = vector.load %arg1[%136, %c0_36, %c0_37] : memref<8x8x512xf32, #tpu.memory_space<vmem>>, vector<1x8x512xf32>
    %138 = vector.shape_cast %137 : vector<1x8x512xf32> to vector<8x512xf32>
    %cst_38 = arith.constant dense<0.000000e+00> : vector<8x512xf32>
    %139 = tpu.matmul %130, %3, %cst_38 {dimension_numbers = #tpu.dot_dimension_numbers<[1], [0], [0], [1], [0, 0, 1, 1], [], []>} : vector<8x128xf32>, vector<128x512xf32>, vector<8x512xf32> -> vector<8x512xf32>
    %140 = arith.addf %138, %139 : vector<8x512xf32>
    %141 = vector.extract_strided_slice %140 {offsets = [0, 0], sizes = [8, 384], strides = [1, 1]} : vector<8x512xf32> to vector<8x384xf32>
    %142 = arith.negf %141 : vector<8x384xf32>
    %143 = math.exp %142 : vector<8x384xf32>
    %cst_39 = arith.constant 1.000000e+00 : f32
    %144 = vector.broadcast %cst_39 : f32 to vector<8x384xf32>
    %145 = arith.addf %144, %143 : vector<8x384xf32>
    %146 = arith.divf %144, %145 : vector<8x384xf32>
    %147 = vector.extract_strided_slice %146 {offsets = [0, 0], sizes = [8, 128], strides = [1, 1]} : vector<8x384xf32> to vector<8x128xf32>
    %148 = vector.extract_strided_slice %146 {offsets = [0, 128], sizes = [8, 128], strides = [1, 1]} : vector<8x384xf32> to vector<8x128xf32>
    %149 = vector.extract_strided_slice %146 {offsets = [0, 256], sizes = [8, 128], strides = [1, 1]} : vector<8x384xf32> to vector<8x128xf32>
    %150 = vector.extract_strided_slice %140 {offsets = [0, 384], sizes = [8, 128], strides = [1, 1]} : vector<8x512xf32> to vector<8x128xf32>
    %151 = math.tanh %150 : vector<8x128xf32>
    %152 = arith.mulf %148, %128 : vector<8x128xf32>
    %153 = arith.mulf %147, %151 : vector<8x128xf32>
    %154 = arith.addf %152, %153 : vector<8x128xf32>
    %155 = math.tanh %154 : vector<8x128xf32>
    %156 = arith.mulf %149, %155 : vector<8x128xf32>
    %157 = arith.truncf %156 : vector<8x128xf32> to vector<8x128xbf16>
    %158 = arith.index_cast %c5_i32 : i32 to index
    %c0_40 = arith.constant 0 : index
    %c0_41 = arith.constant 0 : index
    %159 = vector.load %arg3[%158, %c0_40, %c0_41] : memref<8x8x128xbf16, #tpu.memory_space<vmem>>, vector<1x8x128xbf16>
    %160 = vector.shape_cast %159 : vector<1x8x128xbf16> to vector<8x128xbf16>
    %161 = vector.shape_cast %157 : vector<8x128xbf16> to vector<1x8x128xbf16>
    tpu.vector_store %arg3[%158, %c0_40, %c0_41], %161 {strides = array<i32>} : memref<8x8x128xbf16, #tpu.memory_space<vmem>>, vector<1x8x128xbf16>,
    %c6_i32 = arith.constant 6 : i32
    %162 = arith.index_cast %c6_i32 : i32 to index
    %c0_42 = arith.constant 0 : index
    %c0_43 = arith.constant 0 : index
    %163 = vector.load %arg1[%162, %c0_42, %c0_43] : memref<8x8x512xf32, #tpu.memory_space<vmem>>, vector<1x8x512xf32>
    %164 = vector.shape_cast %163 : vector<1x8x512xf32> to vector<8x512xf32>
    %cst_44 = arith.constant dense<0.000000e+00> : vector<8x512xf32>
    %165 = tpu.matmul %156, %3, %cst_44 {dimension_numbers = #tpu.dot_dimension_numbers<[1], [0], [0], [1], [0, 0, 1, 1], [], []>} : vector<8x128xf32>, vector<128x512xf32>, vector<8x512xf32> -> vector<8x512xf32>
    %166 = arith.addf %164, %165 : vector<8x512xf32>
    %167 = vector.extract_strided_slice %166 {offsets = [0, 0], sizes = [8, 384], strides = [1, 1]} : vector<8x512xf32> to vector<8x384xf32>
    %168 = arith.negf %167 : vector<8x384xf32>
    %169 = math.exp %168 : vector<8x384xf32>
    %cst_45 = arith.constant 1.000000e+00 : f32
    %170 = vector.broadcast %cst_45 : f32 to vector<8x384xf32>
    %171 = arith.addf %170, %169 : vector<8x384xf32>
    %172 = arith.divf %170, %171 : vector<8x384xf32>
    %173 = vector.extract_strided_slice %172 {offsets = [0, 0], sizes = [8, 128], strides = [1, 1]} : vector<8x384xf32> to vector<8x128xf32>
    %174 = vector.extract_strided_slice %172 {offsets = [0, 128], sizes = [8, 128], strides = [1, 1]} : vector<8x384xf32> to vector<8x128xf32>
    %175 = vector.extract_strided_slice %172 {offsets = [0, 256], sizes = [8, 128], strides = [1, 1]} : vector<8x384xf32> to vector<8x128xf32>
    %176 = vector.extract_strided_slice %166 {offsets = [0, 384], sizes = [8, 128], strides = [1, 1]} : vector<8x512xf32> to vector<8x128xf32>
    %177 = math.tanh %176 : vector<8x128xf32>
    %178 = arith.mulf %174, %154 : vector<8x128xf32>
    %179 = arith.mulf %173, %177 : vector<8x128xf32>
    %180 = arith.addf %178, %179 : vector<8x128xf32>
    %181 = math.tanh %180 : vector<8x128xf32>
    %182 = arith.mulf %175, %181 : vector<8x128xf32>
    %183 = arith.truncf %182 : vector<8x128xf32> to vector<8x128xbf16>
    %184 = arith.index_cast %c6_i32 : i32 to index
    %c0_46 = arith.constant 0 : index
    %c0_47 = arith.constant 0 : index
    %185 = vector.load %arg3[%184, %c0_46, %c0_47] : memref<8x8x128xbf16, #tpu.memory_space<vmem>>, vector<1x8x128xbf16>
    %186 = vector.shape_cast %185 : vector<1x8x128xbf16> to vector<8x128xbf16>
    %187 = vector.shape_cast %183 : vector<8x128xbf16> to vector<1x8x128xbf16>
    tpu.vector_store %arg3[%184, %c0_46, %c0_47], %187 {strides = array<i32>} : memref<8x8x128xbf16, #tpu.memory_space<vmem>>, vector<1x8x128xbf16>,
    %c7_i32 = arith.constant 7 : i32
    %188 = arith.index_cast %c7_i32 : i32 to index
    %c0_48 = arith.constant 0 : index
    %c0_49 = arith.constant 0 : index
    %189 = vector.load %arg1[%188, %c0_48, %c0_49] : memref<8x8x512xf32, #tpu.memory_space<vmem>>, vector<1x8x512xf32>
    %190 = vector.shape_cast %189 : vector<1x8x512xf32> to vector<8x512xf32>
    %cst_50 = arith.constant dense<0.000000e+00> : vector<8x512xf32>
    %191 = tpu.matmul %182, %3, %cst_50 {dimension_numbers = #tpu.dot_dimension_numbers<[1], [0], [0], [1], [0, 0, 1, 1], [], []>} : vector<8x128xf32>, vector<128x512xf32>, vector<8x512xf32> -> vector<8x512xf32>
    %192 = arith.addf %190, %191 : vector<8x512xf32>
    %193 = vector.extract_strided_slice %192 {offsets = [0, 0], sizes = [8, 384], strides = [1, 1]} : vector<8x512xf32> to vector<8x384xf32>
    %194 = arith.negf %193 : vector<8x384xf32>
    %195 = math.exp %194 : vector<8x384xf32>
    %cst_51 = arith.constant 1.000000e+00 : f32
    %196 = vector.broadcast %cst_51 : f32 to vector<8x384xf32>
    %197 = arith.addf %196, %195 : vector<8x384xf32>
    %198 = arith.divf %196, %197 : vector<8x384xf32>
    %199 = vector.extract_strided_slice %198 {offsets = [0, 0], sizes = [8, 128], strides = [1, 1]} : vector<8x384xf32> to vector<8x128xf32>
    %200 = vector.extract_strided_slice %198 {offsets = [0, 128], sizes = [8, 128], strides = [1, 1]} : vector<8x384xf32> to vector<8x128xf32>
    %201 = vector.extract_strided_slice %198 {offsets = [0, 256], sizes = [8, 128], strides = [1, 1]} : vector<8x384xf32> to vector<8x128xf32>
    %202 = vector.extract_strided_slice %192 {offsets = [0, 384], sizes = [8, 128], strides = [1, 1]} : vector<8x512xf32> to vector<8x128xf32>
    %203 = math.tanh %202 : vector<8x128xf32>
    %204 = arith.mulf %200, %180 : vector<8x128xf32>
    %205 = arith.mulf %199, %203 : vector<8x128xf32>
    %206 = arith.addf %204, %205 : vector<8x128xf32>
    %207 = math.tanh %206 : vector<8x128xf32>
    %208 = arith.mulf %201, %207 : vector<8x128xf32>
    %209 = arith.truncf %208 : vector<8x128xf32> to vector<8x128xbf16>
    %210 = arith.index_cast %c7_i32 : i32 to index
    %c0_52 = arith.constant 0 : index
    %c0_53 = arith.constant 0 : index
    %211 = vector.load %arg3[%210, %c0_52, %c0_53] : memref<8x8x128xbf16, #tpu.memory_space<vmem>>, vector<1x8x128xbf16>
    %212 = vector.shape_cast %211 : vector<1x8x128xbf16> to vector<8x128xbf16>
    %213 = vector.shape_cast %209 : vector<8x128xbf16> to vector<1x8x128xbf16>
    tpu.vector_store %arg3[%210, %c0_52, %c0_53], %213 {strides = array<i32>} : memref<8x8x128xbf16, #tpu.memory_space<vmem>>, vector<1x8x128xbf16>,
    %c8_i32 = arith.constant 8 : i32
    %c0_54 = arith.constant 0 : index
    %c0_55 = arith.constant 0 : index
    %214 = vector.load %arg6[%c0_54, %c0_55] : memref<8x128xf32, #tpu.memory_space<vmem>>, vector<8x128xf32>
    tpu.vector_store %arg6[%c0_54, %c0_55], %208 {strides = array<i32>} : memref<8x128xf32, #tpu.memory_space<vmem>>, vector<8x128xf32>,
    %c0_56 = arith.constant 0 : index
    %c0_57 = arith.constant 0 : index
    %215 = vector.load %arg7[%c0_56, %c0_57] : memref<8x128xf32, #tpu.memory_space<vmem>>, vector<8x128xf32>
    tpu.vector_store %arg7[%c0_56, %c0_57], %206 {strides = array<i32>} : memref<8x128xf32, #tpu.memory_space<vmem>>, vector<8x128xf32>,
    %c0_i32_58 = arith.constant 0 : i32
    %216 = arith.cmpi eq, %arg0, %c0_i32_58 : i32
    %217 = arith.extui %216 : i1 to i32
    %c0_i32_59 = arith.constant 0 : i32
    %218 = arith.cmpi ne, %217, %c0_i32_59 : i32
    scf.if %218 {
      %c0_60 = arith.constant 0 : index
      %c0_61 = arith.constant 0 : index
      %219 = vector.load %arg4[%c0_60, %c0_61] : memref<8x128xf32, #tpu.memory_space<vmem>>, vector<8x128xf32>
      tpu.vector_store %arg4[%c0_60, %c0_61], %208 {strides = array<i32>} : memref<8x128xf32, #tpu.memory_space<vmem>>, vector<8x128xf32>,
      %c0_62 = arith.constant 0 : index
      %c0_63 = arith.constant 0 : index
      %220 = vector.load %arg5[%c0_62, %c0_63] : memref<8x128xf32, #tpu.memory_space<vmem>>, vector<8x128xf32>
      tpu.vector_store %arg5[%c0_62, %c0_63], %206 {strides = array<i32>} : memref<8x128xf32, #tpu.memory_space<vmem>>, vector<8x128xf32>,
    } else {
    }
    return
  }
  func.func @transform_0(%arg0: i32) -> (i32, i32, i32) {
    %c0_i32 = arith.constant 0 : i32
    %c0_i32_0 = arith.constant 0 : i32
    %c0_i32_1 = arith.constant 0 : i32
    return %arg0, %c0_i32, %c0_i32_0 : i32, i32, i32
  }
  func.func @transform_1(%arg0: i32) -> (i32, i32) {
    %c0_i32 = arith.constant 0 : i32
    %c0_i32_0 = arith.constant 0 : i32
    %c0_i32_1 = arith.constant 0 : i32
    return %c0_i32, %c0_i32_0 : i32, i32
  }
  func.func @transform_2(%arg0: i32) -> (i32, i32, i32) {
    %c0_i32 = arith.constant 0 : i32
    %c0_i32_0 = arith.constant 0 : i32
    %c0_i32_1 = arith.constant 0 : i32
    return %arg0, %c0_i32, %c0_i32_0 : i32, i32, i32
  }
  func.func @transform_3(%arg0: i32) -> (i32, i32) {
    %c0_i32 = arith.constant 0 : i32
    %c0_i32_0 = arith.constant 0 : i32
    %c0_i32_1 = arith.constant 0 : i32
    return %c0_i32, %c0_i32_0 : i32, i32
  }
  func.func @transform_4(%arg0: i32) -> (i32, i32) {
    %c0_i32 = arith.constant 0 : i32
    %c0_i32_0 = arith.constant 0 : i32
    %c0_i32_1 = arith.constant 0 : i32
    return %c0_i32, %c0_i32_0 : i32, i32
  }
}

</mosaic_0001>

<bundles_post_ra>
// kernel: rnnlm_pallas.3
= control target key start
LH: loop header
LB: loop body
LE: loop exit
PB: predicated region body
PF: predicated region fallthrough
CT: control target
= control target key end

     0   :  { %s386_s0 = inlined_call_operand.vmem [shape: bf16[8,8,128], index: 0, kind: input, shape index: {}]   ;;  %s387_s1 = inlined_call_operand.vmem [shape: bf16[128,128], index: 1, kind: input, shape index: {}]   ;;  %s388_s2 = inlined_call_operand.vmem [shape: f32[1,128], index: 2, kind: input, shape index: {}]   ;;  %s389_s3 = inlined_call_operand.hbm [shape: f32[8,8,128], index: 3, kind: output, shape index: {}]  }
   0x1   :  { %v276_v0 = vld [vmem:[%s387_s1] sm:$0xff]   ;;  %v277_v1 = vld [vmem:[%s387_s1 + $0x8] sm:$0xff]   ;;  %v278_v2 = vld [vmem:[%s387_s1 + $0x10] sm:$0xff]  }
   0x2   :  { %233 = vmatprep.subr.bf16.mxu0 %v276_v0  ;;  %257 = vmatprep.subr.bf16.mxu1 %v276_v0  ;;  %v279_v3 = vld [vmem:[%s387_s1 + $0x18] sm:$0xff]   ;;  %v284_v4 = vld [vmem:[%s386_s0] sm:$0xff]   ;;  %v285_v5 = vld [vmem:[%s386_s0 + $0x10] sm:$0xff]  }
   0x3   :  { %234 = vmatpush3.bf16.msra.mxu0 %v276_v0  ;;  %265 = vmatpush3.bf16.msra.mxu1 %v276_v0  ;;  %v280_v6 = vld [vmem:[%s387_s1 + $0x20] sm:$0xff]  }
   0x4   :  { %235 = vmatprep.subr.bf16.mxu0 %v277_v1  ;;  %258 = vmatprep.subr.bf16.mxu1 %v277_v1 }
   0x5   :  { %249 = vmatprep.mubr.bf16.mxu0 %v284_v4 }
   0x7   :  { %236 = vmatpush3.bf16.msra.mxu0 %v277_v1  ;;  %266 = vmatpush3.bf16.msra.mxu1 %v277_v1 }
   0x8   :  { %237 = vmatprep.subr.bf16.mxu0 %v278_v2  ;;  %259 = vmatprep.subr.bf16.mxu1 %v278_v2 }
   0xb   :  { %238 = vmatpush3.bf16.msra.mxu0 %v278_v2  ;;  %267 = vmatpush3.bf16.msra.mxu1 %v278_v2 }
   0xc   :  { %239 = vmatprep.subr.bf16.mxu0 %v279_v3  ;;  %260 = vmatprep.subr.bf16.mxu1 %v279_v3 }
   0xd   :  { %8 = vsyncpa [#allocation3], 0  ;;  %253 = vmatprep.mubr.bf16.mxu1 %v285_v5  ;;  %v281_v7 = vld [vmem:[%s387_s1 + $0x28] sm:$0xff]   ;;  %v282_v8 = vld [vmem:[%s387_s1 + $0x30] sm:$0xff]  }
   0xe   :  { %v283_v9 = vld [vmem:[%s387_s1 + $0x38] sm:$0xff]   ;;  %v286_v10 = vld [vmem:[%s386_s0 + $0x8] sm:$0xff]   ;;  %v208_v12 = vld [vmem:[%s388_s2] ss:$0 sm:$0xff]  ;;  %s312_s1 = smov [#allocation2]  }
   0xf   :  { %240 = vmatpush3.bf16.msra.mxu0 %v279_v3  ;;  %268 = vmatpush3.bf16.msra.mxu1 %v279_v3  ;;  %v287_v11 = vld [vmem:[%s386_s0 + $0x18] sm:$0xff]   ;;  %s197_s11 = sshll.u32 %s312_s1, 4  ;;  %s198_s11 = int_to_ptr.vmem [resolvable:$true] %s197_s11 }
  0x10   :  { %241 = vmatprep.subr.bf16.mxu0 %v280_v6  ;;  %261 = vmatprep.subr.bf16.mxu1 %v280_v6  ;;  %s288_s0 = scalar_lea.vmem %s198_s11, 1024  ;;  %p293_p1 = scmp.lt.s32.totalorder %s198_s11, %s198_s11 }
  0x11   :  { %p289_p0 = scmp.ne.s32.totalorder %s198_s11, %s288_s0  ;;  %p294_p2 = scmp.lt.s32.totalorder %s288_s0, %s288_s0 }
  0x13   :  { %242 = vmatpush3.bf16.msra.mxu0 %v280_v6  ;;  %269 = vmatpush3.bf16.msra.mxu1 %v280_v6  ;;  %p295_p3 = por %p294_p2, %p293_p1 }
  0x14   :  { %243 = vmatprep.subr.bf16.mxu0 %v281_v7  ;;  %262 = vmatprep.subr.bf16.mxu1 %v281_v7 }
  0x15   :  { %p296_p4 = pnand %p295_p3, %p289_p0 }
  0x17   :  { %244 = vmatpush3.bf16.msra.mxu0 %v281_v7  ;;  %270 = vmatpush3.bf16.msra.mxu1 %v281_v7 }
  0x18   :  { %245 = vmatprep.subr.bf16.mxu0 %v282_v8  ;;  %263 = vmatprep.subr.bf16.mxu1 %v282_v8 }
  0x1b   :  { %246 = vmatpush3.bf16.msra.mxu0 %v282_v8  ;;  %271 = vmatpush3.bf16.msra.mxu1 %v282_v8 }
  0x1c   :  { %247 = vmatprep.subr.bf16.mxu0 %v283_v9  ;;  %264 = vmatprep.subr.bf16.mxu1 %v283_v9 }
  0x1f   :  { %248 = vmatpush3.bf16.msra.mxu0 %v283_v9  ;;  %272 = vmatpush3.bf16.msra.mxu1 %v283_v9 }
  0x22   :  { %250 = vmatmul.mubr.bf16.vlgmr.msra.gmra.mrb[0].mxu0 %v286_v10  ;;  %254 = vmatmul.mubr.bf16.vlgmr.msra.gmra.mrb[0].mxu1 %v287_v11 }
  0xf5   :  { %v251_v13 = vpop.f32.mrb[0].mxu0  ;;  %v255_v14 = vpop.f32.mrb[0].mxu1 }
  0xf6   :  { %v162_v15 = vadd.f32 %v251_v13, %v208_v12  ;;  %v178_v16 = vadd.f32 %v255_v14, %v208_v12  ;;  %v153_v17 = vpop.f32.mrb[1].mxu0  ;;  %v169_v18 = vpop.f32.mrb[1].mxu1 }
  0xf7   :  { %v154_v19 = vadd.f32 %v208_v12, %v153_v17  ;;  %v170_v20 = vadd.f32 %v208_v12, %v169_v18  ;;  %v252_v21 = vpop.f32.mrb[2].mxu0  ;;  %v256_v22 = vpop.f32.mrb[2].mxu1 }
  0xf8   :  { %186 = vst [vmem:[#allocation2 + $0x10] sm:$0xff] %v162_v15  ;;  %190 = vst [vmem:[#allocation2 + $0x30] sm:$0xff] %v178_v16  ;;  %v165_v23 = vadd.f32 %v252_v21, %v208_v12  ;;  %v181_v24 = vadd.f32 %v256_v22, %v208_v12  ;;  %v156_v25 = vpop.f32.mrb[3].mxu0  ;;  %v172_v26 = vpop.f32.mrb[3].mxu1 }
  0xf9   :  { %184 = vst [vmem:[#allocation2] sm:$0xff] %v154_v19  ;;  %188 = vst [vmem:[#allocation2 + $0x20] sm:$0xff] %v170_v20  ;;  %v157_v27 = vadd.f32 %v208_v12, %v156_v25  ;;  %v173_v28 = vadd.f32 %v208_v12, %v172_v26 }
  0xfa   :  { %187 = vst [vmem:[#allocation2 + $0x18] sm:$0xff] %v165_v23  ;;  %191 = vst [vmem:[#allocation2 + $0x38] sm:$0xff] %v181_v24 }
  0xfb   :  { %185 = vst [vmem:[#allocation2 + $0x8] sm:$0xff] %v157_v27  ;;  %189 = vst [vmem:[#allocation2 + $0x28] sm:$0xff] %v173_v28 }
  0xfc   :  { %299 = shalt.err (!%p296_p4)
}
  0xfd   :  { %s300_s13 = scalar_lea.hbm %s389_s3, 1024 }
  0xfe   :  { %p301_p5 = scmp.ne.s32.totalorder %s389_s3, %s300_s13  ;;  %p304_p6 = scmp.lt.u32.totalorder %s300_s13, %s389_s3 }
 0x100   :  { %p306_p7 = pnand %p304_p6, %p301_p5 }
 0x102   :  { %309 = shalt.err (!%p306_p7)
}
 0x103   :  { %s313_s18 = smov 128   ;;  %s314_s19 = smov 8  }
 0x104   :  { %203 = dma.vmem_to_hbm [thread:$0]  %s198_s11, 1024, %s389_s3, [#allocation3], %s313_s18, %s313_s18, %s314_s19  }
 0x105   :  { %310 = dma.done.wait [#allocation3], 1024  }
 0x106   :  { %311 = vsyncadd [#allocation3], 4294966272 }
 0x107   :  { %207 = vsyncpa [#allocation3], 1 }

// kernel: rnnlm_pallas.2
= control target key start
LH: loop header
LB: loop body
LE: loop exit
PB: predicated region body
PF: predicated region fallthrough
CT: control target
= control target key end

     0   :  { %10 = vsyncpa [#allocation5], 0  ;;  %v2299_v7 = vmov 0.0   ;;  %s3025_s0 = inlined_call_operand.vmem [shape: f32[8,8,512], index: 0, kind: input, shape index: {}]   ;;  %s3026_s1 = inlined_call_operand.vmem [shape: f32[128,512], index: 1, kind: input, shape index: {}]   ;;  %s3027_s2 = inlined_call_operand.vmem [shape: bf16[8,8,128], index: 2, kind: output, shape index: {0}]   ;;  %s3028_s3 = inlined_call_operand.hbm [shape: f32[8,128], index: 3, kind: output, shape index: {1}]   ;;  %s3029_s4 = inlined_call_operand.hbm [shape: f32[8,128], index: 4, kind: output, shape index: {2}]  }
   0x1   :  { %v23_v0 = vld [vmem:[%s3026_s1 + $0x8] sm:$0xff]  ;;  %v22_v2 = vld [vmem:[%s3026_s1] sm:$0xff]  ;;  %156 = vmatprep.mubr.f32.mxu0 %v2299_v7  ;;  %227 = vmatprep.mubr.f32.mxu1 %v2299_v7  ;;  %v25_v19 = vld [vmem:[%s3026_s1 + $0x18] sm:$0xff] }
   0x2   :  { %v27_v1 = vld [vmem:[%s3026_s1 + $0x28] sm:$0xff]  ;;  %v26_v4 = vld [vmem:[%s3026_s1 + $0x20] sm:$0xff]  ;;  %v29_v20 = vld [vmem:[%s3026_s1 + $0x38] sm:$0xff] }
   0x3   :  { %v2336_v3 = vpack.c.bf16 %v27_v1, %v23_v0  ;;  %v31_v5 = vld [vmem:[%s3026_s1 + $0x48] sm:$0xff]  ;;  %v2349_v8 = vpack.c.bf16 %v26_v4, %v22_v2  ;;  %v30_v10 = vld [vmem:[%s3026_s1 + $0x40] sm:$0xff]  ;;  %v2390_v22 = vpack.c.bf16 %v29_v20, %v25_v19  ;;  %v24_v23 = vld [vmem:[%s3026_s1 + $0x10] sm:$0xff] }
   0x4   :  { %v35_v6 = vld [vmem:[%s3026_s1 + $0x68] sm:$0xff]  ;;  %v34_v11 = vld [vmem:[%s3026_s1 + $0x60] sm:$0xff]  ;;  %v28_v24 = vld [vmem:[%s3026_s1 + $0x30] sm:$0xff] }
   0x5   :  { %v2351_v9 = vpack.c.bf16 %v35_v6, %v31_v5  ;;  %v39_v12 = vld [vmem:[%s3026_s1 + $0x88] sm:$0xff]  ;;  %1609 = vmatprep.subr.bf16.mxu0 %v2336_v3  ;;  %v2367_v14 = vpack.c.bf16 %v34_v11, %v30_v10  ;;  %v38_v15 = vld [vmem:[%s3026_s1 + $0x80] sm:$0xff]  ;;  %v2398_v25 = vpack.c.bf16 %v28_v24, %v24_v23  ;;  %1641 = vmatprep.subr.bf16.mxu1 %v2390_v22  ;;  %v33_v27 = vld [vmem:[%s3026_s1 + $0x58] sm:$0xff] }
   0x6   :  { %v43_v13 = vld [vmem:[%s3026_s1 + $0xa8] sm:$0xff]  ;;  %1611 = vmatpush1.bf16.msra.mxu0 %v2349_v8  ;;  %v42_v16 = vld [vmem:[%s3026_s1 + $0xa0] sm:$0xff]  ;;  %v37_v28 = vld [vmem:[%s3026_s1 + $0x78] sm:$0xff] }
   0x7   :  { %1613 = vmatprep.subr.bf16.mxu0 %v2351_v9  ;;  %v2376_v17 = vpack.c.bf16 %v43_v13, %v39_v12  ;;  %v47_v18 = vld [vmem:[%s3026_s1 + $0xc8] sm:$0xff]  ;;  %v2401_v26 = vpack.c.bf16 %v42_v16, %v38_v15  ;;  %v32_v29 = vld [vmem:[%s3026_s1 + $0x50] sm:$0xff]  ;;  %v46_v31 = vld [vmem:[%s3026_s1 + $0xc0] sm:$0xff]  ;;  %1643 = vmatpush1.bf16.msra.mxu1 %v2398_v25  ;;  %v2423_v33 = vpack.c.bf16 %v37_v28, %v33_v27 }
   0x8   :  { %v51_v21 = vld [vmem:[%s3026_s1 + $0xe8] sm:$0xff]  ;;  %v50_v32 = vld [vmem:[%s3026_s1 + $0xe0] sm:$0xff]  ;;  %v36_v34 = vld [vmem:[%s3026_s1 + $0x70] sm:$0xff] }
   0x9   :  { %v2414_v30 = vpack.c.bf16 %v51_v21, %v47_v18  ;;  %v55_v35 = vld [vmem:[%s3026_s1 + $0x108] sm:$0xff]  ;;  %v2434_v37 = vpack.c.bf16 %v36_v34, %v32_v29  ;;  %v41_v38 = vld [vmem:[%s3026_s1 + $0x98] sm:$0xff]  ;;  %1645 = vmatprep.subr.bf16.mxu1 %v2423_v33  ;;  %v40_v40 = vld [vmem:[%s3026_s1 + $0x90] sm:$0xff]  ;;  %v2450_v42 = vpack.c.bf16 %v50_v32, %v46_v31 }
   0xa   :  { %1615 = vmatpush1.bf16.msra.mxu0 %v2367_v14  ;;  %v59_v36 = vld [vmem:[%s3026_s1 + $0x128] sm:$0xff]  ;;  %v45_v39 = vld [vmem:[%s3026_s1 + $0xb8] sm:$0xff]  ;;  %v44_v41 = vld [vmem:[%s3026_s1 + $0xb0] sm:$0xff] }
   0xb   :  { %1617 = vmatprep.subr.bf16.mxu0 %v2376_v17  ;;  %v54_v43 = vld [vmem:[%s3026_s1 + $0x100] sm:$0xff]  ;;  %v2458_v45 = vpack.c.bf16 %v45_v39, %v41_v38  ;;  %v2461_v46 = vpack.c.bf16 %v59_v36, %v55_v35  ;;  %1647 = vmatpush1.bf16.msra.mxu1 %v2434_v37  ;;  %v63_v47 = vld [vmem:[%s3026_s1 + $0x148] sm:$0xff]  ;;  %v2467_v48 = vpack.c.bf16 %v44_v41, %v40_v40  ;;  %v49_v49 = vld [vmem:[%s3026_s1 + $0xd8] sm:$0xff] }
   0xc   :  { %v58_v44 = vld [vmem:[%s3026_s1 + $0x120] sm:$0xff]  ;;  %v53_v50 = vld [vmem:[%s3026_s1 + $0xf8] sm:$0xff]  ;;  %v67_v51 = vld [vmem:[%s3026_s1 + $0x168] sm:$0xff] }
   0xd   :  { %1649 = vmatprep.subr.bf16.mxu1 %v2458_v45  ;;  %v2479_v52 = vpack.c.bf16 %v53_v50, %v49_v49  ;;  %v48_v53 = vld [vmem:[%s3026_s1 + $0xd0] sm:$0xff]  ;;  %v2488_v55 = vpack.c.bf16 %v58_v44, %v54_v43  ;;  %v57_v56 = vld [vmem:[%s3026_s1 + $0x118] sm:$0xff]  ;;  %v2497_v58 = vpack.c.bf16 %v67_v51, %v63_v47  ;;  %v62_v59 = vld [vmem:[%s3026_s1 + $0x140] sm:$0xff] }
   0xe   :  { %1619 = vmatpush1.bf16.msra.mxu0 %v2401_v26  ;;  %v52_v54 = vld [vmem:[%s3026_s1 + $0xf0] sm:$0xff]  ;;  %v61_v57 = vld [vmem:[%s3026_s1 + $0x138] sm:$0xff]  ;;  %v66_v60 = vld [vmem:[%s3026_s1 + $0x160] sm:$0xff] }
   0xf   :  { %1621 = vmatprep.subr.bf16.mxu0 %v2414_v30  ;;  %1651 = vmatpush1.bf16.msra.mxu1 %v2467_v48  ;;  %v71_v61 = vld [vmem:[%s3026_s1 + $0x188] sm:$0xff]  ;;  %v2509_v62 = vpack.c.bf16 %v52_v54, %v48_v53  ;;  %v2515_v0 = vpack.c.bf16 %v61_v57, %v57_v56  ;;  %v56_v1 = vld [vmem:[%s3026_s1 + $0x110] sm:$0xff]  ;;  %v65_v4 = vld [vmem:[%s3026_s1 + $0x158] sm:$0xff]  ;;  %v2530_v6 = vpack.c.bf16 %v66_v60, %v62_v59 }
  0x10   :  { %v75_v63 = vld [vmem:[%s3026_s1 + $0x1a8] sm:$0xff]  ;;  %1653 = vmatprep.subr.bf16.mxu1 %v2479_v52  ;;  %v60_v2 = vld [vmem:[%s3026_s1 + $0x130] sm:$0xff]  ;;  %v69_v5 = vld [vmem:[%s3026_s1 + $0x178] sm:$0xff] }
  0x11   :  { %v70_v10 = vld [vmem:[%s3026_s1 + $0x180] sm:$0xff]  ;;  %v2536_v11 = vpack.c.bf16 %v75_v63, %v71_v61  ;;  %v79_v13 = vld [vmem:[%s3026_s1 + $0x1c8] sm:$0xff]  ;;  %v2545_v15 = vpack.c.bf16 %v60_v2, %v56_v1 }
  0x12   :  { %1623 = vmatpush1.bf16.msra.mxu0 %v2450_v42  ;;  %v74_v12 = vld [vmem:[%s3026_s1 + $0x1a0] sm:$0xff] }
  0x13   :  { %1625 = vmatprep.subr.bf16.mxu0 %v2461_v46  ;;  %1655 = vmatpush1.bf16.msra.mxu1 %v2509_v62 }
  0x16   :  { %1627 = vmatpush1.bf16.msra.mxu0 %v2488_v55 }
  0x17   :  { %1629 = vmatprep.subr.bf16.mxu0 %v2497_v58 }
  0x18   :  { %11 = vsyncpa [#allocation7], 0  ;;  %v83_v16 = vld [vmem:[%s3026_s1 + $0x1e8] sm:$0xff]  ;;  %1657 = vmatprep.subr.bf16.mxu1 %v2515_v0  ;;  %v2551_v18 = vpack.c.bf16 %v69_v5, %v65_v4  ;;  %v64_v19 = vld [vmem:[%s3026_s1 + $0x150] sm:$0xff]  ;;  %v2566_v24 = vpack.c.bf16 %v74_v12, %v70_v10  ;;  %s2300_s10 = smov [#allocation6]  }
  0x19   :  { %v68_v20 = vld [vmem:[%s3026_s1 + $0x170] sm:$0xff]  ;;  %v73_v21 = vld [vmem:[%s3026_s1 + $0x198] sm:$0xff]  ;;  %v2569_v27 = vpack.c.bf16 %v83_v16, %v79_v13  ;;  %v78_v28 = vld [vmem:[%s3026_s1 + $0x1c0] sm:$0xff]  ;;  %1659 = vmatpush1.bf16.msra.mxu1 %v2545_v15  ;;  %s1535_s11 = sshll.u32 %s2300_s10, 4  ;;  %s1536_s11 = int_to_ptr.vmem [resolvable:$true] %s1535_s11 }
  0x1a   :  { %v77_v23 = vld [vmem:[%s3026_s1 + $0x1b8] sm:$0xff]  ;;  %1631 = vmatpush1.bf16.msra.mxu0 %v2530_v6  ;;  %v82_v29 = vld [vmem:[%s3026_s1 + $0x1e0] sm:$0xff]  ;;  %v2578_v31 = vpack.c.bf16 %v68_v20, %v64_v19  ;;  %1661 = vmatprep.subr.bf16.mxu1 %v2551_v18  ;;  %v72_v34 = vld [vmem:[%s3026_s1 + $0x190] sm:$0xff]  ;;  %p2256_p1 = scmp.lt.s32.totalorder %s1536_s11, %s1536_s11 }
  0x1b   :  { %1633 = vmatprep.subr.bf16.mxu0 %v2536_v11  ;;  %v2581_v32 = vpack.c.bf16 %v77_v23, %v73_v21  ;;  %v76_v35 = vld [vmem:[%s3026_s1 + $0x1b0] sm:$0xff]  ;;  %v81_v36 = vld [vmem:[%s3026_s1 + $0x1d8] sm:$0xff]  ;;  %v2596_v39 = vpack.c.bf16 %v82_v29, %v78_v28  ;;  %v88_v49 = vld [vmem:[%s3025_s0] sm:$0xff] }
  0x1c   :  { %v85_v38 = vld [vmem:[%s3026_s1 + $0x1f8] sm:$0xff]  ;;  %v2600_v40 = vpack.c.bf16 %v76_v35, %v72_v34  ;;  %v80_v43 = vld [vmem:[%s3026_s1 + $0x1d0] sm:$0xff]  ;;  %v89_v50 = vld [vmem:[%s3025_s0 + $0x8] sm:$0xff] }
  0x1d   :  { %1663 = vmatpush1.bf16.msra.mxu1 %v2578_v31  ;;  %v2603_v41 = vpack.c.bf16 %v85_v38, %v81_v36  ;;  %v84_v44 = vld [vmem:[%s3026_s1 + $0x1f0] sm:$0xff]  ;;  %v91_v2 = vld [vmem:[%s3025_s0 + $0x18] sm:$0xff] }
  0x1e   :  { %1635 = vmatpush1.bf16.msra.mxu0 %v2566_v24  ;;  %1665 = vmatprep.subr.bf16.mxu1 %v2581_v32  ;;  %v2613_v47 = vpack.c.bf16 %v84_v44, %v80_v43  ;;  %v90_v60 = vld [vmem:[%s3025_s0 + $0x10] sm:$0xff] }
  0x1f   :  { %1637 = vmatprep.subr.bf16.mxu0 %v2569_v27 }
  0x21   :  { %1667 = vmatpush1.bf16.msra.mxu1 %v2600_v40 }
  0x22   :  { %1639 = vmatpush1.bf16.msra.mxu0 %v2596_v39  ;;  %1669 = vmatprep.subr.bf16.mxu1 %v2603_v41 }
  0x23   :  { %1673 = vmatprep.subr.bf16.mxu0 %v2336_v3 }
  0x25   :  { %157 = vmatmul.mubr.f32.vlgmr.msra.gmra.mrb[0].mxu0 %v2299_v7  ;;  %1671 = vmatpush1.bf16.msra.mxu1 %v2613_v47 }
  0x26   :  { %1675 = vmatpush1.bf16.msra.mxu0 %v2349_v8  ;;  %333 = vmatprep.mubr.f32.mxu0 %v2299_v7 }
  0x27   :  { %1677 = vmatprep.subr.bf16.mxu0 %v2351_v9  ;;  %1705 = vmatprep.subr.bf16.mxu1 %v2390_v22 }
  0x28   :  { %228 = vmatmul.mubr.f32.vlgmr.msra.gmra.mrb[0].mxu1 %v2299_v7 }
  0x29   :  { %1707 = vmatpush1.bf16.msra.mxu1 %v2398_v25  ;;  %404 = vmatprep.mubr.f32.mxu1 %v2299_v7 }
  0x2a   :  { %1679 = vmatpush1.bf16.msra.mxu0 %v2367_v14  ;;  %1709 = vmatprep.subr.bf16.mxu1 %v2423_v33 }
  0x2b   :  { %1681 = vmatprep.subr.bf16.mxu0 %v2376_v17 }
  0x2d   :  { %1711 = vmatpush1.bf16.msra.mxu1 %v2434_v37 }
  0x2e   :  { %1683 = vmatpush1.bf16.msra.mxu0 %v2401_v26  ;;  %1713 = vmatprep.subr.bf16.mxu1 %v2458_v45 }
  0x2f   :  { %1685 = vmatprep.subr.bf16.mxu0 %v2414_v30 }
  0x31   :  { %1715 = vmatpush1.bf16.msra.mxu1 %v2467_v48 }
  0x32   :  { %1687 = vmatpush1.bf16.msra.mxu0 %v2450_v42  ;;  %1717 = vmatprep.subr.bf16.mxu1 %v2479_v52 }
  0x33   :  { %1689 = vmatprep.subr.bf16.mxu0 %v2461_v46 }
  0x35   :  { %1719 = vmatpush1.bf16.msra.mxu1 %v2509_v62 }
  0x36   :  { %1691 = vmatpush1.bf16.msra.mxu0 %v2488_v55  ;;  %1721 = vmatprep.subr.bf16.mxu1 %v2515_v0 }
  0x37   :  { %1693 = vmatprep.subr.bf16.mxu0 %v2497_v58 }
  0x39   :  { %1723 = vmatpush1.bf16.msra.mxu1 %v2545_v15 }
  0x3a   :  { %1695 = vmatpush1.bf16.msra.mxu0 %v2530_v6  ;;  %1725 = vmatprep.subr.bf16.mxu1 %v2551_v18 }
  0x3b   :  { %1697 = vmatprep.subr.bf16.mxu0 %v2536_v11 }
  0x3d   :  { %1727 = vmatpush1.bf16.msra.mxu1 %v2578_v31 }
  0x3e   :  { %1699 = vmatpush1.bf16.msra.mxu0 %v2566_v24  ;;  %1729 = vmatprep.subr.bf16.mxu1 %v2581_v32 }
  0x3f   :  { %1701 = vmatprep.subr.bf16.mxu0 %v2569_v27 }
  0x41   :  { %1731 = vmatpush1.bf16.msra.mxu1 %v2600_v40 }
  0x42   :  { %1703 = vmatpush1.bf16.msra.mxu0 %v2596_v39  ;;  %1733 = vmatprep.subr.bf16.mxu1 %v2603_v41 }
  0x43   :  { %1737 = vmatprep.subr.bf16.mxu0 %v2336_v3 }
  0x45   :  { %1735 = vmatpush1.bf16.msra.mxu1 %v2613_v47 }
  0x46   :  { %1769 = vmatprep.subr.bf16.mxu1 %v2390_v22 }
  0xf8   :  { %v158_v51 = vpop.f32.mrb[0].mxu0 }
  0xf9   :  { %v234_v53 = vadd.f32 %v158_v51, %v88_v49  ;;  %v160_v54 = vpop.f32.mrb[1].mxu0  ;;  %v1552_v49 = vld [vmem:[%s3025_s0 + $0x20] sm:$0xff] }
  0xfa   :  { %v235_v56 = vadd.f32 %v160_v54, %v89_v50  ;;  %v1553_v50 = vld [vmem:[%s3025_s0 + $0x28] sm:$0xff] }
  0xfb   :  { %v1549_v57 = vmul.f32 -1.442695, %v234_v53  ;;  %v229_v61 = vpop.f32.mrb[0].mxu1 }
  0xfc   :  { %v1550_v59 = vmul.f32 -1.442695, %v235_v56  ;;  %v231_v63 = vpop.f32.mrb[1].mxu1  ;;  %v236_v1 = vadd.f32 %v229_v61, %v90_v60 }
  0xfd   :  { %2123 = vpow2.f32 %v1549_v57  ;;  %v237_v5 = vadd.f32 %v231_v63, %v91_v2  ;;  %v1554_v63 = vld [vmem:[%s3025_s0 + $0x30] sm:$0xff]  ;;  %v1555_v2 = vld [vmem:[%s3025_s0 + $0x38] sm:$0xff] }
  0xfe   :  { %2125 = vpow2.f32 %v1550_v59  ;;  %v1551_v4 = vmul.f32 -1.442695, %v236_v1 }
 0x100   :  { %2127 = vpow2.f32 %v1551_v4 }
 0x101   :  { %2129 = vtanh.f32 %v237_v5 }
 0x107   :  { %v2124_v10 = vpop.eup %2123 }
 0x108   :  { %v2126_v12 = vpop.eup %2125  ;;  %v247_v13 = vadd.f32 1.0, %v2124_v10 }
 0x109   :  { %v248_v16 = vadd.f32 1.0, %v2126_v12 }
 0x10a   :  { %2131 = vrcp.f32 %v247_v13  ;;  %v2128_v19 = vpop.eup %2127 }
 0x10b   :  { %2133 = vrcp.f32 %v248_v16  ;;  %v2130_v20 = vpop.eup %2129  ;;  %v249_v23 = vadd.f32 1.0, %v2128_v19 }
 0x10d   :  { %2135 = vrcp.f32 %v249_v23 }
 0x114   :  { %v2132_v21 = vpop.eup %2131 }
 0x115   :  { %v2134_v28 = vpop.eup %2133  ;;  %v258_v29 = vmul.f32 %v2132_v21, %v2130_v20 }
 0x116   :  { %v257_v34 = vmul.f32 0.0, %v2134_v28 }
 0x117   :  { %v2136_v36 = vpop.eup %2135 }
 0x118   :  { %v2667_v35 = vadd.f32 %v258_v29, %v257_v34 }
 0x11a   :  { %2137 = vtanh.f32 %v2667_v35 }
 0x124   :  { %v2138_v38 = vpop.eup %2137 }
 0x125   :  { %v261_v43 = vmul.f32 %v2138_v38, %v2136_v36 }
 0x127   :  { %v262_v44 = vpack.c.bf16 %v261_v43, %v261_v43  ;;  %334 = vmatmul.mubr.f32.vlgmr.msra.gmra.mrb[2].mxu0 %v261_v43  ;;  %405 = vmatmul.mubr.f32.vlgmr.msra.gmra.mrb[2].mxu1 %v261_v43 }
 0x128   :  { %1739 = vmatpush1.bf16.msra.mxu0 %v2349_v8  ;;  %1771 = vmatpush1.bf16.msra.mxu1 %v2398_v25 }
 0x129   :  { %263 = vst [vmem:[%s3027_s2] sm:$0xf] %v262_v44  ;;  %1741 = vmatprep.subr.bf16.mxu0 %v2351_v9  ;;  %1773 = vmatprep.subr.bf16.mxu1 %v2423_v33 }
 0x12a   :  { %511 = vmatprep.mubr.f32.mxu0 %v2299_v7  ;;  %582 = vmatprep.mubr.f32.mxu1 %v2299_v7 }
 0x12c   :  { %1743 = vmatpush1.bf16.msra.mxu0 %v2367_v14  ;;  %1775 = vmatpush1.bf16.msra.mxu1 %v2434_v37 }
 0x12d   :  { %1745 = vmatprep.subr.bf16.mxu0 %v2376_v17  ;;  %1777 = vmatprep.subr.bf16.mxu1 %v2458_v45 }
 0x130   :  { %1747 = vmatpush1.bf16.msra.mxu0 %v2401_v26  ;;  %1779 = vmatpush1.bf16.msra.mxu1 %v2467_v48 }
 0x131   :  { %1749 = vmatprep.subr.bf16.mxu0 %v2414_v30  ;;  %1781 = vmatprep.subr.bf16.mxu1 %v2479_v52 }
 0x134   :  { %1751 = vmatpush1.bf16.msra.mxu0 %v2450_v42  ;;  %1783 = vmatpush1.bf16.msra.mxu1 %v2509_v62 }
 0x135   :  { %1753 = vmatprep.subr.bf16.mxu0 %v2461_v46  ;;  %1785 = vmatprep.subr.bf16.mxu1 %v2515_v0 }
 0x138   :  { %1755 = vmatpush1.bf16.msra.mxu0 %v2488_v55  ;;  %1787 = vmatpush1.bf16.msra.mxu1 %v2545_v15 }
 0x139   :  { %1757 = vmatprep.subr.bf16.mxu0 %v2497_v58  ;;  %1789 = vmatprep.subr.bf16.mxu1 %v2551_v18 }
 0x13c   :  { %1759 = vmatpush1.bf16.msra.mxu0 %v2530_v6  ;;  %1791 = vmatpush1.bf16.msra.mxu1 %v2578_v31 }
 0x13d   :  { %1761 = vmatprep.subr.bf16.mxu0 %v2536_v11  ;;  %1793 = vmatprep.subr.bf16.mxu1 %v2581_v32 }
 0x140   :  { %1763 = vmatpush1.bf16.msra.mxu0 %v2566_v24  ;;  %1795 = vmatpush1.bf16.msra.mxu1 %v2600_v40 }
 0x141   :  { %1765 = vmatprep.subr.bf16.mxu0 %v2569_v27  ;;  %1797 = vmatprep.subr.bf16.mxu1 %v2603_v41 }
 0x144   :  { %1767 = vmatpush1.bf16.msra.mxu0 %v2596_v39  ;;  %1799 = vmatpush1.bf16.msra.mxu1 %v2613_v47 }
 0x145   :  { %1801 = vmatprep.subr.bf16.mxu0 %v2336_v3  ;;  %1833 = vmatprep.subr.bf16.mxu1 %v2390_v22 }
 0x1fa   :  { %v335_v51 = vpop.f32.mrb[2].mxu0  ;;  %v406_v53 = vpop.f32.mrb[2].mxu1 }
 0x1fb   :  { %v411_v54 = vadd.f32 %v1552_v49, %v335_v51  ;;  %v337_v56 = vpop.f32.mrb[3].mxu0  ;;  %v408_v57 = vpop.f32.mrb[3].mxu1  ;;  %v413_v1 = vadd.f32 %v1554_v63, %v406_v53  ;;  %v1562_v63 = vld [vmem:[%s3025_s0 + $0x50] sm:$0xff] }
 0x1fc   :  { %v412_v59 = vadd.f32 %v1553_v50, %v337_v56  ;;  %v414_v4 = vadd.f32 %v1555_v2, %v408_v57  ;;  %v1561_v50 = vld [vmem:[%s3025_s0 + $0x48] sm:$0xff]  ;;  %v1563_v2 = vld [vmem:[%s3025_s0 + $0x58] sm:$0xff] }
 0x1fd   :  { %v1556_v60 = vmul.f32 -1.442695, %v411_v54  ;;  %v1558_v5 = vmul.f32 -1.442695, %v413_v1 }
 0x1fe   :  { %v1557_v61 = vmul.f32 -1.442695, %v412_v59 }
 0x1ff   :  { %2139 = vpow2.f32 %v1556_v60 }
 0x200   :  { %2141 = vpow2.f32 %v1557_v61 }
 0x201   :  { %2143 = vtanh.f32 %v414_v4 }
 0x202   :  { %2145 = vpow2.f32 %v1558_v5 }
 0x209   :  { %v2140_v10 = vpop.eup %2139 }
 0x20a   :  { %v424_v12 = vadd.f32 1.0, %v2140_v10  ;;  %v2142_v13 = vpop.eup %2141 }
 0x20b   :  { %v425_v16 = vadd.f32 1.0, %v2142_v13  ;;  %v2144_v19 = vpop.eup %2143 }
 0x20c   :  { %2147 = vrcp.f32 %v424_v12  ;;  %v2146_v20 = vpop.eup %2145 }
 0x20d   :  { %2149 = vrcp.f32 %v425_v16  ;;  %v426_v29 = vadd.f32 1.0, %v2146_v20 }
 0x20f   :  { %2151 = vrcp.f32 %v426_v29 }
 0x216   :  { %v2148_v21 = vpop.eup %2147 }
 0x217   :  { %v435_v23 = vmul.f32 %v2148_v21, %v2144_v19  ;;  %v2150_v28 = vpop.eup %2149 }
 0x218   :  { %v434_v34 = vmul.f32 %v2150_v28, %v2667_v35  ;;  %v1560_v35 = vld [vmem:[%s3025_s0 + $0x40] sm:$0xff] }
 0x219   :  { %v2152_v38 = vpop.eup %2151 }
 0x21a   :  { %v2720_v36 = vadd.f32 %v435_v23, %v434_v34 }
 0x21c   :  { %2153 = vtanh.f32 %v2720_v36 }
 0x226   :  { %v2154_v43 = vpop.eup %2153 }
 0x227   :  { %v438_v44 = vmul.f32 %v2154_v43, %v2152_v38 }
 0x229   :  { %v439_v49 = vpack.c.bf16 %v438_v44, %v438_v44  ;;  %512 = vmatmul.mubr.f32.vlgmr.msra.gmra.mrb[4].mxu0 %v438_v44  ;;  %583 = vmatmul.mubr.f32.vlgmr.msra.gmra.mrb[4].mxu1 %v438_v44 }
 0x22a   :  { %1803 = vmatpush1.bf16.msra.mxu0 %v2349_v8  ;;  %1835 = vmatpush1.bf16.msra.mxu1 %v2398_v25 }
 0x22b   :  { %1559 = vst [vmem:[%s3027_s2 + $0x4] sm:$0xf] %v439_v49  ;;  %1805 = vmatprep.subr.bf16.mxu0 %v2351_v9  ;;  %1837 = vmatprep.subr.bf16.mxu1 %v2423_v33 }
 0x22c   :  { %689 = vmatprep.mubr.f32.mxu0 %v2299_v7  ;;  %760 = vmatprep.mubr.f32.mxu1 %v2299_v7 }
 0x22e   :  { %1807 = vmatpush1.bf16.msra.mxu0 %v2367_v14  ;;  %1839 = vmatpush1.bf16.msra.mxu1 %v2434_v37 }
 0x22f   :  { %1809 = vmatprep.subr.bf16.mxu0 %v2376_v17  ;;  %1841 = vmatprep.subr.bf16.mxu1 %v2458_v45 }
 0x232   :  { %1811 = vmatpush1.bf16.msra.mxu0 %v2401_v26  ;;  %1843 = vmatpush1.bf16.msra.mxu1 %v2467_v48 }
 0x233   :  { %1813 = vmatprep.subr.bf16.mxu0 %v2414_v30  ;;  %1845 = vmatprep.subr.bf16.mxu1 %v2479_v52 }
 0x236   :  { %1815 = vmatpush1.bf16.msra.mxu0 %v2450_v42  ;;  %1847 = vmatpush1.bf16.msra.mxu1 %v2509_v62 }
 0x237   :  { %1817 = vmatprep.subr.bf16.mxu0 %v2461_v46  ;;  %1849 = vmatprep.subr.bf16.mxu1 %v2515_v0 }
 0x23a   :  { %1819 = vmatpush1.bf16.msra.mxu0 %v2488_v55  ;;  %1851 = vmatpush1.bf16.msra.mxu1 %v2545_v15 }
 0x23b   :  { %1821 = vmatprep.subr.bf16.mxu0 %v2497_v58  ;;  %1853 = vmatprep.subr.bf16.mxu1 %v2551_v18 }
 0x23e   :  { %1823 = vmatpush1.bf16.msra.mxu0 %v2530_v6  ;;  %1855 = vmatpush1.bf16.msra.mxu1 %v2578_v31 }
 0x23f   :  { %1825 = vmatprep.subr.bf16.mxu0 %v2536_v11  ;;  %1857 = vmatprep.subr.bf16.mxu1 %v2581_v32 }
 0x242   :  { %1827 = vmatpush1.bf16.msra.mxu0 %v2566_v24  ;;  %1859 = vmatpush1.bf16.msra.mxu1 %v2600_v40 }
 0x243   :  { %1829 = vmatprep.subr.bf16.mxu0 %v2569_v27  ;;  %1861 = vmatprep.subr.bf16.mxu1 %v2603_v41 }
 0x246   :  { %1831 = vmatpush1.bf16.msra.mxu0 %v2596_v39  ;;  %1863 = vmatpush1.bf16.msra.mxu1 %v2613_v47 }
 0x247   :  { %1865 = vmatprep.subr.bf16.mxu0 %v2336_v3  ;;  %1897 = vmatprep.subr.bf16.mxu1 %v2390_v22 }
 0x2fc   :  { %v513_v51 = vpop.f32.mrb[4].mxu0  ;;  %v584_v53 = vpop.f32.mrb[4].mxu1 }
 0x2fd   :  { %v589_v54 = vadd.f32 %v1560_v35, %v513_v51  ;;  %v515_v56 = vpop.f32.mrb[5].mxu0  ;;  %v586_v57 = vpop.f32.mrb[5].mxu1  ;;  %v591_v1 = vadd.f32 %v1562_v63, %v584_v53  ;;  %v1570_v63 = vld [vmem:[%s3025_s0 + $0x70] sm:$0xff] }
 0x2fe   :  { %v590_v59 = vadd.f32 %v1561_v50, %v515_v56  ;;  %v592_v4 = vadd.f32 %v1563_v2, %v586_v57  ;;  %v1569_v50 = vld [vmem:[%s3025_s0 + $0x68] sm:$0xff]  ;;  %v1571_v2 = vld [vmem:[%s3025_s0 + $0x78] sm:$0xff] }
 0x2ff   :  { %v1564_v60 = vmul.f32 -1.442695, %v589_v54  ;;  %v1566_v5 = vmul.f32 -1.442695, %v591_v1 }
 0x300   :  { %v1565_v61 = vmul.f32 -1.442695, %v590_v59 }
 0x301   :  { %2155 = vpow2.f32 %v1564_v60 }
 0x302   :  { %2157 = vpow2.f32 %v1565_v61 }
 0x303   :  { %2159 = vtanh.f32 %v592_v4 }
 0x304   :  { %2161 = vpow2.f32 %v1566_v5 }
 0x30b   :  { %v2156_v10 = vpop.eup %2155 }
 0x30c   :  { %v602_v12 = vadd.f32 1.0, %v2156_v10  ;;  %v2158_v13 = vpop.eup %2157 }
 0x30d   :  { %v603_v16 = vadd.f32 1.0, %v2158_v13  ;;  %v2160_v19 = vpop.eup %2159 }
 0x30e   :  { %2163 = vrcp.f32 %v602_v12  ;;  %v2162_v20 = vpop.eup %2161 }
 0x30f   :  { %2165 = vrcp.f32 %v603_v16  ;;  %v604_v29 = vadd.f32 1.0, %v2162_v20 }
 0x311   :  { %2167 = vrcp.f32 %v604_v29 }
 0x318   :  { %v2164_v21 = vpop.eup %2163 }
 0x319   :  { %v613_v23 = vmul.f32 %v2164_v21, %v2160_v19  ;;  %v2166_v28 = vpop.eup %2165 }
 0x31a   :  { %v612_v34 = vmul.f32 %v2166_v28, %v2720_v36  ;;  %v1568_v36 = vld [vmem:[%s3025_s0 + $0x60] sm:$0xff] }
 0x31b   :  { %v2168_v43 = vpop.eup %2167 }
 0x31c   :  { %v2773_v38 = vadd.f32 %v613_v23, %v612_v34 }
 0x31e   :  { %2169 = vtanh.f32 %v2773_v38 }
 0x328   :  { %v2170_v44 = vpop.eup %2169 }
 0x329   :  { %v616_v49 = vmul.f32 %v2170_v44, %v2168_v43 }
 0x32b   :  { %v617_v35 = vpack.c.bf16 %v616_v49, %v616_v49  ;;  %690 = vmatmul.mubr.f32.vlgmr.msra.gmra.mrb[6].mxu0 %v616_v49  ;;  %761 = vmatmul.mubr.f32.vlgmr.msra.gmra.mrb[6].mxu1 %v616_v49 }
 0x32c   :  { %1867 = vmatpush1.bf16.msra.mxu0 %v2349_v8  ;;  %1899 = vmatpush1.bf16.msra.mxu1 %v2398_v25 }
 0x32d   :  { %1567 = vst [vmem:[%s3027_s2 + $0x8] sm:$0xf] %v617_v35  ;;  %1869 = vmatprep.subr.bf16.mxu0 %v2351_v9  ;;  %1901 = vmatprep.subr.bf16.mxu1 %v2423_v33 }
 0x32e   :  { %867 = vmatprep.mubr.f32.mxu0 %v2299_v7  ;;  %938 = vmatprep.mubr.f32.mxu1 %v2299_v7 }
 0x330   :  { %1871 = vmatpush1.bf16.msra.mxu0 %v2367_v14  ;;  %1903 = vmatpush1.bf16.msra.mxu1 %v2434_v37 }
 0x331   :  { %1873 = vmatprep.subr.bf16.mxu0 %v2376_v17  ;;  %1905 = vmatprep.subr.bf16.mxu1 %v2458_v45 }
 0x334   :  { %1875 = vmatpush1.bf16.msra.mxu0 %v2401_v26  ;;  %1907 = vmatpush1.bf16.msra.mxu1 %v2467_v48 }
 0x335   :  { %1877 = vmatprep.subr.bf16.mxu0 %v2414_v30  ;;  %1909 = vmatprep.subr.bf16.mxu1 %v2479_v52 }
 0x338   :  { %1879 = vmatpush1.bf16.msra.mxu0 %v2450_v42  ;;  %1911 = vmatpush1.bf16.msra.mxu1 %v2509_v62 }
 0x339   :  { %1881 = vmatprep.subr.bf16.mxu0 %v2461_v46  ;;  %1913 = vmatprep.subr.bf16.mxu1 %v2515_v0 }
 0x33c   :  { %1883 = vmatpush1.bf16.msra.mxu0 %v2488_v55  ;;  %1915 = vmatpush1.bf16.msra.mxu1 %v2545_v15 }
 0x33d   :  { %1885 = vmatprep.subr.bf16.mxu0 %v2497_v58  ;;  %1917 = vmatprep.subr.bf16.mxu1 %v2551_v18 }
 0x340   :  { %1887 = vmatpush1.bf16.msra.mxu0 %v2530_v6  ;;  %1919 = vmatpush1.bf16.msra.mxu1 %v2578_v31 }
 0x341   :  { %1889 = vmatprep.subr.bf16.mxu0 %v2536_v11  ;;  %1921 = vmatprep.subr.bf16.mxu1 %v2581_v32 }
 0x344   :  { %1891 = vmatpush1.bf16.msra.mxu0 %v2566_v24  ;;  %1923 = vmatpush1.bf16.msra.mxu1 %v2600_v40 }
 0x345   :  { %1893 = vmatprep.subr.bf16.mxu0 %v2569_v27  ;;  %1925 = vmatprep.subr.bf16.mxu1 %v2603_v41 }
 0x348   :  { %1895 = vmatpush1.bf16.msra.mxu0 %v2596_v39  ;;  %1927 = vmatpush1.bf16.msra.mxu1 %v2613_v47 }
 0x349   :  { %1929 = vmatprep.subr.bf16.mxu0 %v2336_v3  ;;  %1961 = vmatprep.subr.bf16.mxu1 %v2390_v22 }
 0x3fe   :  { %v691_v51 = vpop.f32.mrb[6].mxu0  ;;  %v762_v53 = vpop.f32.mrb[6].mxu1 }
 0x3ff   :  { %v767_v54 = vadd.f32 %v1568_v36, %v691_v51  ;;  %v693_v56 = vpop.f32.mrb[7].mxu0  ;;  %v764_v57 = vpop.f32.mrb[7].mxu1  ;;  %v769_v1 = vadd.f32 %v1570_v63, %v762_v53  ;;  %v1578_v63 = vld [vmem:[%s3025_s0 + $0x90] sm:$0xff] }
 0x400   :  { %v768_v59 = vadd.f32 %v1569_v50, %v693_v56  ;;  %v770_v4 = vadd.f32 %v1571_v2, %v764_v57  ;;  %v1577_v50 = vld [vmem:[%s3025_s0 + $0x88] sm:$0xff]  ;;  %v1579_v2 = vld [vmem:[%s3025_s0 + $0x98] sm:$0xff] }
 0x401   :  { %v1572_v60 = vmul.f32 -1.442695, %v767_v54  ;;  %v1574_v5 = vmul.f32 -1.442695, %v769_v1 }
 0x402   :  { %v1573_v61 = vmul.f32 -1.442695, %v768_v59 }
 0x403   :  { %2171 = vpow2.f32 %v1572_v60 }
 0x404   :  { %2173 = vpow2.f32 %v1573_v61 }
 0x405   :  { %2175 = vtanh.f32 %v770_v4 }
 0x406   :  { %2177 = vpow2.f32 %v1574_v5 }
 0x40d   :  { %v2172_v10 = vpop.eup %2171 }
 0x40e   :  { %v780_v12 = vadd.f32 1.0, %v2172_v10  ;;  %v2174_v13 = vpop.eup %2173 }
 0x40f   :  { %v781_v16 = vadd.f32 1.0, %v2174_v13  ;;  %v2176_v19 = vpop.eup %2175 }
 0x410   :  { %2179 = vrcp.f32 %v780_v12  ;;  %v2178_v20 = vpop.eup %2177 }
 0x411   :  { %2181 = vrcp.f32 %v781_v16  ;;  %v782_v29 = vadd.f32 1.0, %v2178_v20 }
 0x413   :  { %2183 = vrcp.f32 %v782_v29 }
 0x41a   :  { %v2180_v21 = vpop.eup %2179 }
 0x41b   :  { %v791_v23 = vmul.f32 %v2180_v21, %v2176_v19  ;;  %v2182_v28 = vpop.eup %2181 }
 0x41c   :  { %v790_v34 = vmul.f32 %v2182_v28, %v2773_v38  ;;  %v1576_v38 = vld [vmem:[%s3025_s0 + $0x80] sm:$0xff] }
 0x41d   :  { %v2184_v44 = vpop.eup %2183 }
 0x41e   :  { %v2826_v43 = vadd.f32 %v791_v23, %v790_v34 }
 0x420   :  { %2185 = vtanh.f32 %v2826_v43 }
 0x42a   :  { %v2186_v49 = vpop.eup %2185 }
 0x42b   :  { %v794_v35 = vmul.f32 %v2186_v49, %v2184_v44 }
 0x42d   :  { %v795_v36 = vpack.c.bf16 %v794_v35, %v794_v35  ;;  %868 = vmatmul.mubr.f32.vlgmr.msra.gmra.mrb[8].mxu0 %v794_v35  ;;  %939 = vmatmul.mubr.f32.vlgmr.msra.gmra.mrb[8].mxu1 %v794_v35 }
 0x42e   :  { %1931 = vmatpush1.bf16.msra.mxu0 %v2349_v8  ;;  %1963 = vmatpush1.bf16.msra.mxu1 %v2398_v25 }
 0x42f   :  { %1575 = vst [vmem:[%s3027_s2 + $0xc] sm:$0xf] %v795_v36  ;;  %1933 = vmatprep.subr.bf16.mxu0 %v2351_v9  ;;  %1965 = vmatprep.subr.bf16.mxu1 %v2423_v33 }
 0x430   :  { %1045 = vmatprep.mubr.f32.mxu0 %v2299_v7  ;;  %1116 = vmatprep.mubr.f32.mxu1 %v2299_v7 }
 0x432   :  { %1935 = vmatpush1.bf16.msra.mxu0 %v2367_v14  ;;  %1967 = vmatpush1.bf16.msra.mxu1 %v2434_v37 }
 0x433   :  { %1937 = vmatprep.subr.bf16.mxu0 %v2376_v17  ;;  %1969 = vmatprep.subr.bf16.mxu1 %v2458_v45 }
 0x436   :  { %1939 = vmatpush1.bf16.msra.mxu0 %v2401_v26  ;;  %1971 = vmatpush1.bf16.msra.mxu1 %v2467_v48 }
 0x437   :  { %1941 = vmatprep.subr.bf16.mxu0 %v2414_v30  ;;  %1973 = vmatprep.subr.bf16.mxu1 %v2479_v52 }
 0x43a   :  { %1943 = vmatpush1.bf16.msra.mxu0 %v2450_v42  ;;  %1975 = vmatpush1.bf16.msra.mxu1 %v2509_v62 }
 0x43b   :  { %1945 = vmatprep.subr.bf16.mxu0 %v2461_v46  ;;  %1977 = vmatprep.subr.bf16.mxu1 %v2515_v0 }
 0x43e   :  { %1947 = vmatpush1.bf16.msra.mxu0 %v2488_v55  ;;  %1979 = vmatpush1.bf16.msra.mxu1 %v2545_v15 }
 0x43f   :  { %1949 = vmatprep.subr.bf16.mxu0 %v2497_v58  ;;  %1981 = vmatprep.subr.bf16.mxu1 %v2551_v18 }
 0x442   :  { %1951 = vmatpush1.bf16.msra.mxu0 %v2530_v6  ;;  %1983 = vmatpush1.bf16.msra.mxu1 %v2578_v31 }
 0x443   :  { %1953 = vmatprep.subr.bf16.mxu0 %v2536_v11  ;;  %1985 = vmatprep.subr.bf16.mxu1 %v2581_v32 }
 0x446   :  { %1955 = vmatpush1.bf16.msra.mxu0 %v2566_v24  ;;  %1987 = vmatpush1.bf16.msra.mxu1 %v2600_v40 }
 0x447   :  { %1957 = vmatprep.subr.bf16.mxu0 %v2569_v27  ;;  %1989 = vmatprep.subr.bf16.mxu1 %v2603_v41 }
 0x44a   :  { %1959 = vmatpush1.bf16.msra.mxu0 %v2596_v39  ;;  %1991 = vmatpush1.bf16.msra.mxu1 %v2613_v47 }
 0x44b   :  { %1993 = vmatprep.subr.bf16.mxu0 %v2336_v3  ;;  %2025 = vmatprep.subr.bf16.mxu1 %v2390_v22 }
 0x500   :  { %v869_v51 = vpop.f32.mrb[8].mxu0  ;;  %v940_v53 = vpop.f32.mrb[8].mxu1 }
 0x501   :  { %v945_v54 = vadd.f32 %v1576_v38, %v869_v51  ;;  %v871_v56 = vpop.f32.mrb[9].mxu0  ;;  %v942_v57 = vpop.f32.mrb[9].mxu1  ;;  %v947_v1 = vadd.f32 %v1578_v63, %v940_v53  ;;  %v1587_v63 = vld [vmem:[%s3025_s0 + $0xb8] sm:$0xff] }
 0x502   :  { %v946_v59 = vadd.f32 %v1577_v50, %v871_v56  ;;  %v948_v4 = vadd.f32 %v1579_v2, %v942_v57  ;;  %v1585_v50 = vld [vmem:[%s3025_s0 + $0xa8] sm:$0xff] }
 0x503   :  { %v1580_v60 = vmul.f32 -1.442695, %v945_v54  ;;  %v1582_v5 = vmul.f32 -1.442695, %v947_v1 }
 0x504   :  { %v1581_v61 = vmul.f32 -1.442695, %v946_v59 }
 0x505   :  { %2187 = vpow2.f32 %v1580_v60 }
 0x506   :  { %2189 = vpow2.f32 %v1581_v61 }
 0x507   :  { %2191 = vtanh.f32 %v948_v4 }
 0x508   :  { %2193 = vpow2.f32 %v1582_v5 }
 0x50f   :  { %v2188_v10 = vpop.eup %2187 }
 0x510   :  { %v958_v12 = vadd.f32 1.0, %v2188_v10  ;;  %v2190_v13 = vpop.eup %2189 }
 0x511   :  { %v959_v16 = vadd.f32 1.0, %v2190_v13  ;;  %v2192_v19 = vpop.eup %2191 }
 0x512   :  { %2195 = vrcp.f32 %v958_v12  ;;  %v2194_v20 = vpop.eup %2193 }
 0x513   :  { %2197 = vrcp.f32 %v959_v16  ;;  %v960_v29 = vadd.f32 1.0, %v2194_v20 }
 0x515   :  { %2199 = vrcp.f32 %v960_v29 }
 0x51c   :  { %v2196_v21 = vpop.eup %2195 }
 0x51d   :  { %v969_v23 = vmul.f32 %v2196_v21, %v2192_v19  ;;  %v2198_v28 = vpop.eup %2197 }
 0x51e   :  { %v968_v34 = vmul.f32 %v2198_v28, %v2826_v43  ;;  %v1584_v43 = vld [vmem:[%s3025_s0 + $0xa0] sm:$0xff] }
 0x51f   :  { %v2200_v49 = vpop.eup %2199 }
 0x520   :  { %v2879_v44 = vadd.f32 %v969_v23, %v968_v34 }
 0x522   :  { %2201 = vtanh.f32 %v2879_v44 }
 0x52c   :  { %v2202_v35 = vpop.eup %2201 }
 0x52d   :  { %v972_v36 = vmul.f32 %v2202_v35, %v2200_v49 }
 0x52f   :  { %v973_v38 = vpack.c.bf16 %v972_v36, %v972_v36  ;;  %1046 = vmatmul.mubr.f32.vlgmr.msra.gmra.mrb[10].mxu0 %v972_v36  ;;  %1117 = vmatmul.mubr.f32.vlgmr.msra.gmra.mrb[10].mxu1 %v972_v36 }
 0x530   :  { %1995 = vmatpush1.bf16.msra.mxu0 %v2349_v8  ;;  %2027 = vmatpush1.bf16.msra.mxu1 %v2398_v25 }
 0x531   :  { %1583 = vst [vmem:[%s3027_s2 + $0x10] sm:$0xf] %v973_v38  ;;  %1997 = vmatprep.subr.bf16.mxu0 %v2351_v9  ;;  %2029 = vmatprep.subr.bf16.mxu1 %v2423_v33  ;;  %v1601_v38 = vld [vmem:[%s3025_s0 + $0xe8] sm:$0xff] }
 0x532   :  { %1223 = vmatprep.mubr.f32.mxu0 %v2299_v7  ;;  %1294 = vmatprep.mubr.f32.mxu1 %v2299_v7 }
 0x534   :  { %1999 = vmatpush1.bf16.msra.mxu0 %v2367_v14  ;;  %2031 = vmatpush1.bf16.msra.mxu1 %v2434_v37 }
 0x535   :  { %2001 = vmatprep.subr.bf16.mxu0 %v2376_v17  ;;  %2033 = vmatprep.subr.bf16.mxu1 %v2458_v45 }
 0x538   :  { %2003 = vmatpush1.bf16.msra.mxu0 %v2401_v26  ;;  %2035 = vmatpush1.bf16.msra.mxu1 %v2467_v48 }
 0x539   :  { %2005 = vmatprep.subr.bf16.mxu0 %v2414_v30  ;;  %2037 = vmatprep.subr.bf16.mxu1 %v2479_v52 }
 0x53c   :  { %2007 = vmatpush1.bf16.msra.mxu0 %v2450_v42  ;;  %2039 = vmatpush1.bf16.msra.mxu1 %v2509_v62 }
 0x53d   :  { %2009 = vmatprep.subr.bf16.mxu0 %v2461_v46  ;;  %2041 = vmatprep.subr.bf16.mxu1 %v2515_v0 }
 0x540   :  { %2011 = vmatpush1.bf16.msra.mxu0 %v2488_v55  ;;  %2043 = vmatpush1.bf16.msra.mxu1 %v2545_v15 }
 0x541   :  { %2013 = vmatprep.subr.bf16.mxu0 %v2497_v58  ;;  %2045 = vmatprep.subr.bf16.mxu1 %v2551_v18 }
 0x544   :  { %2015 = vmatpush1.bf16.msra.mxu0 %v2530_v6  ;;  %2047 = vmatpush1.bf16.msra.mxu1 %v2578_v31 }
 0x545   :  { %2017 = vmatprep.subr.bf16.mxu0 %v2536_v11  ;;  %2049 = vmatprep.subr.bf16.mxu1 %v2581_v32 }
 0x548   :  { %2019 = vmatpush1.bf16.msra.mxu0 %v2566_v24  ;;  %2051 = vmatpush1.bf16.msra.mxu1 %v2600_v40 }
 0x549   :  { %2021 = vmatprep.subr.bf16.mxu0 %v2569_v27  ;;  %2053 = vmatprep.subr.bf16.mxu1 %v2603_v41 }
 0x54c   :  { %2023 = vmatpush1.bf16.msra.mxu0 %v2596_v39  ;;  %2055 = vmatpush1.bf16.msra.mxu1 %v2613_v47 }
 0x54d   :  { %2057 = vmatprep.subr.bf16.mxu0 %v2336_v3  ;;  %2089 = vmatprep.subr.bf16.mxu1 %v2390_v22  ;;  %v1586_v3 = vld [vmem:[%s3025_s0 + $0xb0] sm:$0xff] }
 0x602   :  { %v1047_v51 = vpop.f32.mrb[10].mxu0  ;;  %v1118_v53 = vpop.f32.mrb[10].mxu1 }
 0x603   :  { %v1123_v54 = vadd.f32 %v1584_v43, %v1047_v51  ;;  %v1049_v56 = vpop.f32.mrb[11].mxu0  ;;  %v1120_v57 = vpop.f32.mrb[11].mxu1  ;;  %v1125_v22 = vadd.f32 %v1586_v3, %v1118_v53  ;;  %v1603_v3 = vld [vmem:[%s3025_s0 + $0xf8] sm:$0xff] }
 0x604   :  { %v1124_v59 = vadd.f32 %v1585_v50, %v1049_v56  ;;  %v1126_v1 = vadd.f32 %v1587_v63, %v1120_v57 }
 0x605   :  { %v1588_v60 = vmul.f32 -1.442695, %v1123_v54  ;;  %v1590_v2 = vmul.f32 -1.442695, %v1125_v22 }
 0x606   :  { %v1589_v61 = vmul.f32 -1.442695, %v1124_v59 }
 0x607   :  { %2203 = vpow2.f32 %v1588_v60  ;;  %v1602_v60 = vld [vmem:[%s3025_s0 + $0xf0] sm:$0xff] }
 0x608   :  { %2205 = vpow2.f32 %v1589_v61 }
 0x609   :  { %2207 = vtanh.f32 %v1126_v1 }
 0x60a   :  { %2209 = vpow2.f32 %v1590_v2 }
 0x611   :  { %v2204_v4 = vpop.eup %2203 }
 0x612   :  { %v1136_v5 = vadd.f32 1.0, %v2204_v4  ;;  %v2206_v10 = vpop.eup %2205 }
 0x613   :  { %v1137_v12 = vadd.f32 1.0, %v2206_v10  ;;  %v2208_v13 = vpop.eup %2207 }
 0x614   :  { %2211 = vrcp.f32 %v1136_v5  ;;  %v2210_v16 = vpop.eup %2209 }
 0x615   :  { %2213 = vrcp.f32 %v1137_v12  ;;  %v1138_v23 = vadd.f32 1.0, %v2210_v16 }
 0x617   :  { %2215 = vrcp.f32 %v1138_v23 }
 0x61e   :  { %v2212_v19 = vpop.eup %2211 }
 0x61f   :  { %v1147_v20 = vmul.f32 %v2212_v19, %v2208_v13  ;;  %v2214_v21 = vpop.eup %2213 }
 0x620   :  { %v1146_v28 = vmul.f32 %v2214_v21, %v2879_v44  ;;  %v1600_v44 = vld [vmem:[%s3025_s0 + $0xe0] sm:$0xff] }
 0x621   :  { %v2216_v34 = vpop.eup %2215 }
 0x622   :  { %v2932_v29 = vadd.f32 %v1147_v20, %v1146_v28 }
 0x624   :  { %2217 = vtanh.f32 %v2932_v29 }
 0x62e   :  { %v2218_v49 = vpop.eup %2217 }
 0x62f   :  { %v1150_v35 = vmul.f32 %v2218_v49, %v2216_v34 }
 0x631   :  { %v1151_v36 = vpack.c.bf16 %v1150_v35, %v1150_v35  ;;  %1224 = vmatmul.mubr.f32.vlgmr.msra.gmra.mrb[12].mxu0 %v1150_v35  ;;  %1295 = vmatmul.mubr.f32.vlgmr.msra.gmra.mrb[12].mxu1 %v1150_v35 }
 0x632   :  { %2059 = vmatpush1.bf16.msra.mxu0 %v2349_v8  ;;  %2091 = vmatpush1.bf16.msra.mxu1 %v2398_v25  ;;  %v1593_v8 = vld [vmem:[%s3025_s0 + $0xc8] sm:$0xff] }
 0x633   :  { %1591 = vst [vmem:[%s3027_s2 + $0x14] sm:$0xf] %v1151_v36  ;;  %2061 = vmatprep.subr.bf16.mxu0 %v2351_v9  ;;  %2093 = vmatprep.subr.bf16.mxu1 %v2423_v33 }
 0x634   :  { %1401 = vmatprep.mubr.f32.mxu0 %v2299_v7  ;;  %1472 = vmatprep.mubr.f32.mxu1 %v2299_v7  ;;  %v1592_v7 = vld [vmem:[%s3025_s0 + $0xc0] sm:$0xff] }
 0x636   :  { %2063 = vmatpush1.bf16.msra.mxu0 %v2367_v14  ;;  %2095 = vmatpush1.bf16.msra.mxu1 %v2434_v37 }
 0x637   :  { %2065 = vmatprep.subr.bf16.mxu0 %v2376_v17  ;;  %2097 = vmatprep.subr.bf16.mxu1 %v2458_v45 }
 0x63a   :  { %2067 = vmatpush1.bf16.msra.mxu0 %v2401_v26  ;;  %2099 = vmatpush1.bf16.msra.mxu1 %v2467_v48 }
 0x63b   :  { %2069 = vmatprep.subr.bf16.mxu0 %v2414_v30  ;;  %2101 = vmatprep.subr.bf16.mxu1 %v2479_v52 }
 0x63e   :  { %2071 = vmatpush1.bf16.msra.mxu0 %v2450_v42  ;;  %2103 = vmatpush1.bf16.msra.mxu1 %v2509_v62  ;;  %v1594_v42 = vld [vmem:[%s3025_s0 + $0xd0] sm:$0xff] }
 0x63f   :  { %2073 = vmatprep.subr.bf16.mxu0 %v2461_v46  ;;  %2105 = vmatprep.subr.bf16.mxu1 %v2515_v0  ;;  %v1595_v46 = vld [vmem:[%s3025_s0 + $0xd8] sm:$0xff]  ;;  %s2251_s0 = scalar_lea.vmem %s1536_s11, 128 }
 0x640   :  { %p2252_p0 = scmp.ne.s32.totalorder %s1536_s11, %s2251_s0  ;;  %p2257_p2 = scmp.lt.s32.totalorder %s2251_s0, %s2251_s0 }
 0x642   :  { %2075 = vmatpush1.bf16.msra.mxu0 %v2488_v55  ;;  %2107 = vmatpush1.bf16.msra.mxu1 %v2545_v15  ;;  %p2258_p3 = por %p2257_p2, %p2256_p1 }
 0x643   :  { %2077 = vmatprep.subr.bf16.mxu0 %v2497_v58  ;;  %2109 = vmatprep.subr.bf16.mxu1 %v2551_v18 }
 0x644   :  { %p2259_p4 = pnand %p2258_p3, %p2252_p0 }
 0x646   :  { %2079 = vmatpush1.bf16.msra.mxu0 %v2530_v6  ;;  %2111 = vmatpush1.bf16.msra.mxu1 %v2578_v31 }
 0x647   :  { %2081 = vmatprep.subr.bf16.mxu0 %v2536_v11  ;;  %2113 = vmatprep.subr.bf16.mxu1 %v2581_v32 }
 0x64a   :  { %2083 = vmatpush1.bf16.msra.mxu0 %v2566_v24  ;;  %2115 = vmatpush1.bf16.msra.mxu1 %v2600_v40 }
 0x64b   :  { %2085 = vmatprep.subr.bf16.mxu0 %v2569_v27  ;;  %2117 = vmatprep.subr.bf16.mxu1 %v2603_v41 }
 0x64e   :  { %2087 = vmatpush1.bf16.msra.mxu0 %v2596_v39  ;;  %2119 = vmatpush1.bf16.msra.mxu1 %v2613_v47 }
 0x704   :  { %v1225_v9 = vpop.f32.mrb[12].mxu0  ;;  %v1296_v14 = vpop.f32.mrb[12].mxu1 }
 0x705   :  { %v1301_v17 = vadd.f32 %v1592_v7, %v1225_v9  ;;  %v1227_v25 = vpop.f32.mrb[13].mxu0  ;;  %v1298_v26 = vpop.f32.mrb[13].mxu1  ;;  %v1303_v45 = vadd.f32 %v1594_v42, %v1296_v14 }
 0x706   :  { %v1302_v30 = vadd.f32 %v1593_v8, %v1227_v25  ;;  %v1304_v48 = vadd.f32 %v1595_v46, %v1298_v26 }
 0x707   :  { %v1596_v33 = vmul.f32 -1.442695, %v1301_v17  ;;  %v1598_v52 = vmul.f32 -1.442695, %v1303_v45 }
 0x708   :  { %v1597_v37 = vmul.f32 -1.442695, %v1302_v30 }
 0x709   :  { %2219 = vpow2.f32 %v1596_v33 }
 0x70a   :  { %2221 = vpow2.f32 %v1597_v37 }
 0x70b   :  { %2223 = vtanh.f32 %v1304_v48 }
 0x70c   :  { %2225 = vpow2.f32 %v1598_v52 }
 0x713   :  { %v2220_v55 = vpop.eup %2219 }
 0x714   :  { %v1314_v58 = vadd.f32 1.0, %v2220_v55  ;;  %v2222_v62 = vpop.eup %2221 }
 0x715   :  { %v1315_v0 = vadd.f32 1.0, %v2222_v62  ;;  %v2224_v6 = vpop.eup %2223 }
 0x716   :  { %2227 = vrcp.f32 %v1314_v58  ;;  %v2226_v11 = vpop.eup %2225 }
 0x717   :  { %2229 = vrcp.f32 %v1315_v0  ;;  %v1316_v27 = vadd.f32 1.0, %v2226_v11 }
 0x719   :  { %2231 = vrcp.f32 %v1316_v27 }
 0x720   :  { %v2228_v15 = vpop.eup %2227 }
 0x721   :  { %v1325_v18 = vmul.f32 %v2228_v15, %v2224_v6  ;;  %v2230_v24 = vpop.eup %2229 }
 0x722   :  { %v1324_v31 = vmul.f32 %v2230_v24, %v2932_v29 }
 0x723   :  { %v2232_v39 = vpop.eup %2231 }
 0x724   :  { %v1326_v32 = vadd.f32 %v1325_v18, %v1324_v31 }
 0x726   :  { %2233 = vtanh.f32 %v1326_v32 }
 0x730   :  { %v2234_v40 = vpop.eup %2233 }
 0x731   :  { %v1328_v41 = vmul.f32 %v2234_v40, %v2232_v39 }
 0x733   :  { %v1329_v47 = vpack.c.bf16 %v1328_v41, %v1328_v41  ;;  %1402 = vmatmul.mubr.f32.vlgmr.msra.gmra.mrb[14].mxu0 %v1328_v41  ;;  %1473 = vmatmul.mubr.f32.vlgmr.msra.gmra.mrb[14].mxu1 %v1328_v41 }
 0x735   :  { %1599 = vst [vmem:[%s3027_s2 + $0x18] sm:$0xf] %v1329_v47 }
 0x806   :  { %v1403_v43 = vpop.f32.mrb[14].mxu0  ;;  %v1474_v50 = vpop.f32.mrb[14].mxu1 }
 0x807   :  { %v1479_v51 = vadd.f32 %v1600_v44, %v1403_v43  ;;  %v1405_v53 = vpop.f32.mrb[15].mxu0  ;;  %v1476_v54 = vpop.f32.mrb[15].mxu1  ;;  %v1481_v61 = vadd.f32 %v1602_v60, %v1474_v50 }
 0x808   :  { %v1480_v56 = vadd.f32 %v1601_v38, %v1405_v53  ;;  %v1482_v22 = vadd.f32 %v1603_v3, %v1476_v54 }
 0x809   :  { %v1604_v57 = vmul.f32 -1.442695, %v1479_v51  ;;  %v1606_v63 = vmul.f32 -1.442695, %v1481_v61 }
 0x80a   :  { %v1605_v59 = vmul.f32 -1.442695, %v1480_v56 }
 0x80b   :  { %2235 = vpow2.f32 %v1604_v57 }
 0x80c   :  { %2237 = vpow2.f32 %v1605_v59 }
 0x80d   :  { %2239 = vtanh.f32 %v1482_v22 }
 0x80e   :  { %2241 = vpow2.f32 %v1606_v63 }
 0x815   :  { %v2236_v1 = vpop.eup %2235 }
 0x816   :  { %v1492_v2 = vadd.f32 1.0, %v2236_v1  ;;  %v2238_v4 = vpop.eup %2237 }
 0x817   :  { %v1493_v5 = vadd.f32 1.0, %v2238_v4  ;;  %v2240_v10 = vpop.eup %2239 }
 0x818   :  { %2243 = vrcp.f32 %v1492_v2  ;;  %v2242_v12 = vpop.eup %2241 }
 0x819   :  { %2245 = vrcp.f32 %v1493_v5  ;;  %v1494_v20 = vadd.f32 1.0, %v2242_v12 }
 0x81b   :  { %2247 = vrcp.f32 %v1494_v20 }
 0x822   :  { %v2244_v13 = vpop.eup %2243 }
 0x823   :  { %v1503_v16 = vmul.f32 %v2244_v13, %v2240_v10  ;;  %v2246_v19 = vpop.eup %2245 }
 0x824   :  { %v1502_v21 = vmul.f32 %v2246_v19, %v1326_v32 }
 0x826   :  { %v1504_v23 = vadd.f32 %v1503_v16, %v1502_v21 }
 0x828   :  { %1516 = vst [vmem:[#allocation6] sm:$0xff] %v1504_v23  ;;  %2249 = vtanh.f32 %v1504_v23 }
 0x829   :  { %2262 = shalt.err (!%p2259_p4)
}
 0x82a   :  { %s2263_s13 = scalar_lea.hbm %s3029_s4, 128 }
 0x82b   :  { %p2264_p5 = scmp.ne.s32.totalorder %s3029_s4, %s2263_s13  ;;  %p2267_p6 = scmp.lt.u32.totalorder %s2263_s13, %s3029_s4 }
 0x82d   :  { %p2269_p7 = pnand %p2267_p6, %p2264_p5 }
 0x82f   :  { %2272 = shalt.err (!%p2269_p7)
}
 0x830   :  { %1538 = dma.vmem_to_hbm [thread:$0]  %s1536_s11, 128, %s3029_s4, [#allocation7]   ;;  %v2248_v28 = vpop.eup %2247 }
 0x831   :  { %s2301_s20 = smov [#allocation4]  }
 0x832   :  { %s1525_s21 = sshll.u32 %s2301_s20, 4  ;;  %v2250_v29 = vpop.eup %2249  ;;  %s1526_s21 = int_to_ptr.vmem [resolvable:$true] %s1525_s21 }
 0x833   :  { %v1506_v34 = vmul.f32 %v2250_v29, %v2248_v28  ;;  %s2273_s22 = scalar_lea.vmem %s1526_s21, 128  ;;  %p2278_p9 = scmp.lt.s32.totalorder %s1526_s21, %s1526_s21 }
 0x834   :  { %p2274_p8 = scmp.ne.s32.totalorder %s1526_s21, %s2273_s22  ;;  %p2279_p10 = scmp.lt.s32.totalorder %s2273_s22, %s2273_s22 }
 0x835   :  { %v1507_v49 = vpack.c.bf16 %v1506_v34, %v1506_v34  ;;  %1515 = vst [vmem:[#allocation4] sm:$0xff] %v1506_v34 }
 0x836   :  { %p2280_p11 = por %p2279_p10, %p2278_p9 }
 0x838   :  { %p2281_p12 = pnand %p2280_p11, %p2274_p8 }
 0x83a   :  { %2284 = shalt.err (!%p2281_p12)
}
 0x83b   :  { %s2285_s25 = scalar_lea.hbm %s3028_s3, 128 }
 0x83c   :  { %p2286_p13 = scmp.ne.s32.totalorder %s3028_s3, %s2285_s25  ;;  %p2289_p0 = scmp.lt.u32.totalorder %s2285_s25, %s3028_s3 }
 0x83e   :  { %p2291_p1 = pnand %p2289_p0, %p2286_p13 }
 0x840   :  { %2294 = shalt.err (!%p2291_p1)
}
 0x841   :  { %1528 = dma.vmem_to_hbm [thread:$0]  %s1526_s21, 128, %s3028_s3, [#allocation5]   ;;  %1607 = vst [vmem:[%s3027_s2 + $0x1c] sm:$0xf] %v1507_v49 }
 0x842   :  { %2295 = dma.done.wait [#allocation5], 128  }
 0x843   :  { %2296 = vsyncadd [#allocation5], 4294967168 }
 0x844   :  { %2297 = dma.done.wait [#allocation7], 128  }
 0x845   :  { %2298 = vsyncadd [#allocation7], 4294967168 }
 0x846   :  { %1547 = vsyncpa [#allocation5], 1 }
 0x847   :  { %1548 = vsyncpa [#allocation7], 1 }

</bundles_post_ra>
